<compile_context>
chip_gen: v6e
topology: v6e:2x2x1
jax: 0.10.0
libtpu: 0.0.40
codegen_flags: <defaults>
</compile_context>

<pallas_src>
import math

import jax
import jax.numpy as jnp
from jax import lax
from jax.experimental import pallas as pl
from jax.experimental.pallas import tpu as pltpu


def _vmem_spec():
    return pl.BlockSpec(memory_space=pltpu.MemorySpace.VMEM)


# ---------------------------------------------------------------------------
# Fused forward kernel: (l0 + layer-0 in-proj) -> wavefront LSTM -> head+softmax
# ---------------------------------------------------------------------------
def _make_fused_forward_kernel(T, Np, F, H, L):
    """Build the fused kernel for static (T, Np, F, H, L).

    Kernel ref order:
      inputs : x(T*Np,F)            time-major, batch padded to Np
               h0(L,Np,H) c0(L,Np,H)
               w_in0(F,4H)          = W0^T @ Wih0^T, gate-pre-scaled
               w_rec(L,2H,4H)       [0,:H]=Whh0 ; [l>=1]=[Wih_l;Whh_l], pre-scaled
               bias(L,1,4H)         [0]=b0@Wih0^T+bih0+bhh0 ; [l>=1]=bih+bhh, pre-scaled
               w2(H,2) b2(1,2)
      outputs: probs(Np,2) h_n(L,Np,H) c_n(L,Np,H)
    """

    def kernel(x_ref, h0_ref, c0_ref, win0_ref, wrec_ref, bias_ref,
               w2_ref, b2_ref, probs_ref, hN_ref, cN_ref):
        # ---- layer-0 input projection hoisted over the whole sequence -------
        # gin0 row (t*Np + n) = (x[n,t] @ W0^T + b0) @ Wih0^T + bih0 + bhh0
        # (already pre-scaled for the single-tanh gate trick).
        gin0 = (jnp.dot(x_ref[...], win0_ref[...],
                        preferred_element_type=jnp.float32)
                + bias_ref[0])                                  # (T*Np, 4H)

        # ---- stage recurrent weights / biases into vregs once per layer -----
        whh_s = [None] * L
        wih_s = [None] * L
        bias_s = [None] * L
        whh_s[0] = wrec_ref[0][0:H, :]                          # (H, 4H)
        for l in range(1, L):
            w_full = wrec_ref[l]                                # (2H, 4H)
            wih_s[l] = w_full[0:H, :]
            whh_s[l] = w_full[H:2 * H, :]
            bias_s[l] = bias_ref[l]                             # (1, 4H)

        h = [h0_ref[l] for l in range(L)]                       # each (Np, H)
        c = [c0_ref[l] for l in range(L)]

        def gate_update(gates, c_prev):
            # i/f/o columns were pre-scaled by 0.5 on the host, so one tanh over
            # the 4H-wide tile gives sigmoid for i/f/o and tanh for g.
            tg = jnp.tanh(gates)
            i_g = 0.5 * (tg[:, 0 * H:1 * H] + 1.0)
            f_g = 0.5 * (tg[:, 1 * H:2 * H] + 1.0)
            g_g = tg[:, 2 * H:3 * H]
            o_g = 0.5 * (tg[:, 3 * H:4 * H] + 1.0)
            c_new = f_g * c_prev + i_g * g_g
            h_new = o_g * jnp.tanh(c_new)
            return h_new, c_new

        # ---- wavefront recurrence (fully unrolled) ---------------------------
        # Stage s runs layer l at timestep t = s - l.  Layers are visited in
        # decreasing order so layer l reads layer (l-1)'s hidden state from the
        # previous stage (i.e. timestep t) before layer (l-1) overwrites it.
        for s in range(T + L - 1):
            for l in range(L - 1, -1, -1):
                t = s - l
                if t < 0 or t >= T:
                    continue
                if l == 0:
                    gates = (gin0[t * Np:(t + 1) * Np, :]
                             + jnp.dot(h[0], whh_s[0],
                                       preferred_element_type=jnp.float32))
                else:
                    # Per-step input projection fused into the recurrence; the
                    # two small dots are independent and pipeline in the MXU.
                    gates = (jnp.dot(h[l - 1], wih_s[l],
                                     preferred_element_type=jnp.float32)
                             + jnp.dot(h[l], whh_s[l],
                                       preferred_element_type=jnp.float32)
                             + bias_s[l])
                h[l], c[l] = gate_update(gates, c[l])

        for l in range(L):
            hN_ref[l] = h[l]
            cN_ref[l] = c[l]

        # ---- head: softmax(h_T @ W2 + b2) over the 2 classes -----------------
        logits = (jnp.dot(h[L - 1], w2_ref[...],
                          preferred_element_type=jnp.float32)
                  + b2_ref[...])                                # (Np, 2)
        m = jnp.max(logits, axis=-1, keepdims=True)
        e = jnp.exp(logits - m)
        denom = jnp.sum(e, axis=-1, keepdims=True)
        probs_ref[...] = e * pl.reciprocal(denom, approx=True)

    return kernel


def _build_fused_call(T, Np, F, H, L, n_out=2):
    kernel = _make_fused_forward_kernel(T, Np, F, H, L)
    n_inputs = 8
    return pl.pallas_call(
        kernel,
        out_shape=(
            jax.ShapeDtypeStruct((Np, n_out), jnp.float32),
            jax.ShapeDtypeStruct((L, Np, H), jnp.float32),
            jax.ShapeDtypeStruct((L, Np, H), jnp.float32),
        ),
        in_specs=[_vmem_spec() for _ in range(n_inputs)],
        out_specs=tuple(_vmem_spec() for _ in range(3)),
    )


# ---------------------------------------------------------------------------
# Model wrapper (parameter init mirrors the PyTorch module's shapes / init)
# ---------------------------------------------------------------------------
class RNNModelPallas:
    def __init__(self, key, rnn_len=2, hidden_state=32, feature_num=29):
        self.n_layer = rnn_len
        self.nhid = hidden_state
        self.feat = feature_num
        keys = jax.random.split(key, 2 + 4 * rnn_len + 2)
        ki = iter(keys)

        F, H, L = feature_num, hidden_state, rnn_len

        # l0: Linear(F, F), weight ~ U(-0.1, 0.1), bias = 0
        self.w0 = jax.random.uniform(next(ki), (F, F), jnp.float32, -0.1, 0.1)
        self.b0 = jnp.zeros((F,), jnp.float32)

        # LSTM(num_layers=rnn_len): PyTorch default init U(-1/sqrt(H), 1/sqrt(H))
        k = 1.0 / math.sqrt(H)
        self.wih, self.whh, self.bih, self.bhh = [], [], [], []
        for layer in range(L):
            din = F if layer == 0 else H
            self.wih.append(jax.random.uniform(next(ki), (4 * H, din),
                                               jnp.float32, -k, k))
            self.whh.append(jax.random.uniform(next(ki), (4 * H, H),
                                               jnp.float32, -k, k))
            self.bih.append(jax.random.uniform(next(ki), (4 * H,),
                                               jnp.float32, -k, k))
            self.bhh.append(jax.random.uniform(next(ki), (4 * H,),
                                               jnp.float32, -k, k))

        # l2: Linear(H, 2), weight ~ U(-0.1, 0.1), bias = 0
        self.w2 = jax.random.uniform(next(ki), (2, H), jnp.float32, -0.1, 0.1)
        self.b2 = jnp.zeros((2,), jnp.float32)

        # ------------------------------------------------------------------
        # Kernel-ready parameters (all host/XLA precompute, nothing on the
        # kernel's critical path):
        #   * gate_scale folded in: i/f/o columns scaled by 0.5 so the kernel's
        #     single tanh implements sigmoid(x)=0.5*(1+tanh(x/2)).
        #   * l0 fused into layer 0's input projection (HIGHEST precision).
        #   * recurrent weights stacked (L,2H,4H), biases stacked (L,1,4H)
        #     to cut the number of tiny input DMAs.
        # ------------------------------------------------------------------
        col = jnp.arange(4 * H)
        gscale = jnp.where((col >= 2 * H) & (col < 3 * H),
                           1.0, 0.5).astype(jnp.float32)        # (4H,)

        hp = jax.lax.Precision.HIGHEST
        self._w_in0 = (jnp.dot(self.w0.T, self.wih[0].T, precision=hp)
                       * gscale).astype(jnp.float32)            # (F, 4H)
        b_in0 = (jnp.dot(self.b0, self.wih[0].T, precision=hp)
                 + self.bih[0] + self.bhh[0]) * gscale          # (4H,)

        w_rec = jnp.zeros((L, 2 * H, 4 * H), jnp.float32)
        w_rec = w_rec.at[0, :H, :].set(self.whh[0].T * gscale)
        biases = [b_in0]
        for l in range(1, L):
            w_rec = w_rec.at[l, :H, :].set(self.wih[l].T * gscale)
            w_rec = w_rec.at[l, H:, :].set(self.whh[l].T * gscale)
            biases.append((self.bih[l] + self.bhh[l]) * gscale)
        self._w_rec = w_rec                                     # (L, 2H, 4H)
        self._biases = jnp.stack(biases).reshape(L, 1, 4 * H).astype(jnp.float32)

        self._w2_t = self.w2.T.astype(jnp.float32)              # (H, 2)
        self._b2_r = self.b2.reshape(1, -1).astype(jnp.float32)  # (1, 2)

        # One jitted executable: padding/reshape + the single fused pallas_call.
        self._forward_jit = jax.jit(self._forward_impl)

        # TODO(synk): dropout branch (p=0.2) is a no-op here since dropout=False default.
        # TODO(synk): var_hidden (per-layer hidden sizes) config path not implemented.

    def init_hidden(self, bsz):
        shape = (self.n_layer, bsz, self.nhid)
        return (jnp.zeros(shape, jnp.float32), jnp.zeros(shape, jnp.float32))

    def _forward_impl(self, x, h0, c0):
        N, T, F = x.shape
        H, L = self.nhid, self.n_layer
        # Pad the batch to one sublane tile so every per-timestep slab is a full
        # (8,128) vreg inside the kernel (no masked selects on the recurrence).
        Np = max(8, ((N + 7) // 8) * 8)

        x_tm = jnp.transpose(x, (1, 0, 2)).astype(jnp.float32)           # (T, N, F)
        x_tm = jnp.pad(x_tm, ((0, 0), (0, Np - N), (0, 0))).reshape(T * Np, F)
        h0p = jnp.pad(h0.astype(jnp.float32), ((0, 0), (0, Np - N), (0, 0)))
        c0p = jnp.pad(c0.astype(jnp.float32), ((0, 0), (0, Np - N), (0, 0)))

        call = _build_fused_call(T, Np, F, H, L)
        probs_p, hN_p, cN_p = call(x_tm, h0p, c0p, self._w_in0, self._w_rec,
                                   self._biases, self._w2_t, self._b2_r)
        # Padded rows are computed benignly but never exposed as real output.
        return probs_p[:N], (hN_p[:, :N], cN_p[:, :N])

    def forward(self, x, hidden):
        # x: (N, seq, F)   hidden: ((L, N, H), (L, N, H))
        h0, c0 = hidden
        return self._forward_jit(x, h0, c0)


# ---------------------------------------------------------------------------
# Pure-JAX reference (for a correctness sanity check)
# ---------------------------------------------------------------------------
def forward_ref(model, x, hidden):
    N, T, F = x.shape
    h_all, c_all = hidden
    o1 = x.reshape(N * T, F) @ model.w0.T + model.b0
    layer_in = o1.reshape(N, T, F)
    h_fin, c_fin = [], []
    H = model.nhid
    for layer in range(model.n_layer):
        wih, whh = model.wih[layer], model.whh[layer]
        b = model.bih[layer] + model.bhh[layer]
        h, c = h_all[layer], c_all[layer]
        ys = []
        for t in range(T):
            gates = layer_in[:, t, :] @ wih.T + h @ whh.T + b
            i_g = jax.nn.sigmoid(gates[:, 0 * H:1 * H])
            f_g = jax.nn.sigmoid(gates[:, 1 * H:2 * H])
            g_g = jnp.tanh(gates[:, 2 * H:3 * H])
            o_g = jax.nn.sigmoid(gates[:, 3 * H:4 * H])
            c = f_g * c + i_g * g_g
            h = o_g * jnp.tanh(c)
            ys.append(h)
        layer_in = jnp.stack(ys, axis=1)
        h_fin.append(h)
        c_fin.append(c)
    o3 = layer_in[:, -1, :]
    logits = o3 @ model.w2.T + model.b2
    return jax.nn.softmax(logits, axis=-1), (jnp.stack(h_fin), jnp.stack(c_fin))


if __name__ == "__main__":
    key = jax.random.PRNGKey(0)
    k_param, k_x = jax.random.split(key)

    N, SEQ, FEAT, HID, LAYERS = 2, 8, 29, 32, 2
    model = RNNModelPallas(k_param, rnn_len=LAYERS, hidden_state=HID, feature_num=FEAT)

    x = jax.random.normal(k_x, (N, SEQ, FEAT), jnp.float32)
    hidden = model.init_hidden(N)

    out, (h_n, c_n) = model.forward(x, hidden)
    jax.block_until_ready((out, h_n, c_n))

    out_ref, (h_ref, c_ref) = forward_ref(model, x, hidden)
    assert out.shape == (N, 2)
    assert h_n.shape == (LAYERS, N, HID) and c_n.shape == (LAYERS, N, HID)
    assert jnp.allclose(h_n, h_ref, rtol=1e-3, atol=1e-3)
    assert jnp.allclose(c_n, c_ref, rtol=1e-3, atol=1e-3)
    # Slightly looser tolerance on the probabilities only: the fused head uses
    # pl.reciprocal(approx=True) (EUP) instead of an exact divide.
    assert jnp.allclose(out, out_ref, rtol=2e-3, atol=2e-3)

    print("KERNEL_OK")
</pallas_src>

<mosaic_0001>
module attributes {stable_mosaic.version = 11 : i64} {
  func.func @kernel(%arg0: memref<64x29xf32, #tpu.memory_space<vmem>>, %arg1: memref<2x8x32xf32, #tpu.memory_space<vmem>>, %arg2: memref<2x8x32xf32, #tpu.memory_space<vmem>>, %arg3: memref<29x128xf32, #tpu.memory_space<vmem>>, %arg4: memref<2x64x128xf32, #tpu.memory_space<vmem>>, %arg5: memref<2x1x128xf32, #tpu.memory_space<vmem>>, %arg6: memref<32x2xf32, #tpu.memory_space<vmem>>, %arg7: memref<1x2xf32, #tpu.memory_space<vmem>>, %arg8: memref<8x2xf32, #tpu.memory_space<vmem>>, %arg9: memref<2x8x32xf32, #tpu.memory_space<vmem>>, %arg10: memref<2x8x32xf32, #tpu.memory_space<vmem>>) attributes {dimension_semantics = [], scalar_prefetch = 0 : i64, scratch_operands = 0 : i64, tpu.core_type = #tpu.core_type<tc>} {
    %c0 = arith.constant 0 : index
    %c0_0 = arith.constant 0 : index
    %0 = vector.load %arg0[%c0, %c0_0] : memref<64x29xf32, #tpu.memory_space<vmem>>, vector<64x29xf32>
    %c0_1 = arith.constant 0 : index
    %c0_2 = arith.constant 0 : index
    %1 = vector.load %arg3[%c0_1, %c0_2] : memref<29x128xf32, #tpu.memory_space<vmem>>, vector<29x128xf32>
    %cst = arith.constant dense<0.000000e+00> : vector<64x128xf32>
    %2 = tpu.matmul %0, %1, %cst {dimension_numbers = #tpu.dot_dimension_numbers<[1], [0], [0], [1], [0, 0, 1, 1], [], []>} : vector<64x29xf32>, vector<29x128xf32>, vector<64x128xf32> -> vector<64x128xf32>
    %c0_3 = arith.constant 0 : index
    %c0_4 = arith.constant 0 : index
    %c0_5 = arith.constant 0 : index
    %3 = vector.load %arg5[%c0_3, %c0_4, %c0_5] : memref<2x1x128xf32, #tpu.memory_space<vmem>>, vector<1x1x128xf32>
    %4 = vector.shape_cast %3 : vector<1x1x128xf32> to vector<1x128xf32>
    %5 = vector.broadcast %4 : vector<1x128xf32> to vector<64x128xf32>
    %6 = arith.addf %2, %5 : vector<64x128xf32>
    %c0_6 = arith.constant 0 : index
    %c0_7 = arith.constant 0 : index
    %c0_8 = arith.constant 0 : index
    %7 = vector.load %arg4[%c0_6, %c0_7, %c0_8] : memref<2x64x128xf32, #tpu.memory_space<vmem>>, vector<1x64x128xf32>
    %8 = vector.shape_cast %7 : vector<1x64x128xf32> to vector<64x128xf32>
    %9 = vector.extract_strided_slice %8 {offsets = [0, 0], sizes = [32, 128], strides = [1, 1]} : vector<64x128xf32> to vector<32x128xf32>
    %c1 = arith.constant 1 : index
    %c0_9 = arith.constant 0 : index
    %c0_10 = arith.constant 0 : index
    %10 = vector.load %arg4[%c1, %c0_9, %c0_10] : memref<2x64x128xf32, #tpu.memory_space<vmem>>, vector<1x64x128xf32>
    %11 = vector.shape_cast %10 : vector<1x64x128xf32> to vector<64x128xf32>
    %12 = vector.extract_strided_slice %11 {offsets = [0, 0], sizes = [32, 128], strides = [1, 1]} : vector<64x128xf32> to vector<32x128xf32>
    %13 = vector.extract_strided_slice %11 {offsets = [32, 0], sizes = [32, 128], strides = [1, 1]} : vector<64x128xf32> to vector<32x128xf32>
    %c1_11 = arith.constant 1 : index
    %c0_12 = arith.constant 0 : index
    %c0_13 = arith.constant 0 : index
    %14 = vector.load %arg5[%c1_11, %c0_12, %c0_13] : memref<2x1x128xf32, #tpu.memory_space<vmem>>, vector<1x1x128xf32>
    %15 = vector.shape_cast %14 : vector<1x1x128xf32> to vector<1x128xf32>
    %c0_14 = arith.constant 0 : index
    %c0_15 = arith.constant 0 : index
    %c0_16 = arith.constant 0 : index
    %16 = vector.load %arg1[%c0_14, %c0_15, %c0_16] : memref<2x8x32xf32, #tpu.memory_space<vmem>>, vector<1x8x32xf32>
    %17 = vector.shape_cast %16 : vector<1x8x32xf32> to vector<8x32xf32>
    %c1_17 = arith.constant 1 : index
    %c0_18 = arith.constant 0 : index
    %c0_19 = arith.constant 0 : index
    %18 = vector.load %arg1[%c1_17, %c0_18, %c0_19] : memref<2x8x32xf32, #tpu.memory_space<vmem>>, vector<1x8x32xf32>
    %19 = vector.shape_cast %18 : vector<1x8x32xf32> to vector<8x32xf32>
    %c0_20 = arith.constant 0 : index
    %c0_21 = arith.constant 0 : index
    %c0_22 = arith.constant 0 : index
    %20 = vector.load %arg2[%c0_20, %c0_21, %c0_22] : memref<2x8x32xf32, #tpu.memory_space<vmem>>, vector<1x8x32xf32>
    %21 = vector.shape_cast %20 : vector<1x8x32xf32> to vector<8x32xf32>
    %c1_23 = arith.constant 1 : index
    %c0_24 = arith.constant 0 : index
    %c0_25 = arith.constant 0 : index
    %22 = vector.load %arg2[%c1_23, %c0_24, %c0_25] : memref<2x8x32xf32, #tpu.memory_space<vmem>>, vector<1x8x32xf32>
    %23 = vector.shape_cast %22 : vector<1x8x32xf32> to vector<8x32xf32>
    %24 = vector.extract_strided_slice %6 {offsets = [0, 0], sizes = [8, 128], strides = [1, 1]} : vector<64x128xf32> to vector<8x128xf32>
    %cst_26 = arith.constant dense<0.000000e+00> : vector<8x128xf32>
    %25 = tpu.matmul %17, %9, %cst_26 {dimension_numbers = #tpu.dot_dimension_numbers<[1], [0], [0], [1], [0, 0, 1, 1], [], []>} : vector<8x32xf32>, vector<32x128xf32>, vector<8x128xf32> -> vector<8x128xf32>
    %26 = arith.addf %24, %25 : vector<8x128xf32>
    %27 = math.tanh %26 : vector<8x128xf32>
    %28 = vector.extract_strided_slice %27 {offsets = [0, 0], sizes = [8, 32], strides = [1, 1]} : vector<8x128xf32> to vector<8x32xf32>
    %cst_27 = arith.constant 1.000000e+00 : f32
    %29 = vector.broadcast %cst_27 : f32 to vector<8x32xf32>
    %30 = arith.addf %28, %29 : vector<8x32xf32>
    %cst_28 = arith.constant 5.000000e-01 : f32
    %31 = vector.broadcast %cst_28 : f32 to vector<8x32xf32>
    %32 = arith.mulf %31, %30 : vector<8x32xf32>
    %33 = vector.extract_strided_slice %27 {offsets = [0, 32], sizes = [8, 32], strides = [1, 1]} : vector<8x128xf32> to vector<8x32xf32>
    %cst_29 = arith.constant 1.000000e+00 : f32
    %34 = vector.broadcast %cst_29 : f32 to vector<8x32xf32>
    %35 = arith.addf %33, %34 : vector<8x32xf32>
    %cst_30 = arith.constant 5.000000e-01 : f32
    %36 = vector.broadcast %cst_30 : f32 to vector<8x32xf32>
    %37 = arith.mulf %36, %35 : vector<8x32xf32>
    %38 = vector.extract_strided_slice %27 {offsets = [0, 64], sizes = [8, 32], strides = [1, 1]} : vector<8x128xf32> to vector<8x32xf32>
    %39 = vector.extract_strided_slice %27 {offsets = [0, 96], sizes = [8, 32], strides = [1, 1]} : vector<8x128xf32> to vector<8x32xf32>
    %cst_31 = arith.constant 1.000000e+00 : f32
    %40 = vector.broadcast %cst_31 : f32 to vector<8x32xf32>
    %41 = arith.addf %39, %40 : vector<8x32xf32>
    %cst_32 = arith.constant 5.000000e-01 : f32
    %42 = vector.broadcast %cst_32 : f32 to vector<8x32xf32>
    %43 = arith.mulf %42, %41 : vector<8x32xf32>
    %44 = arith.mulf %37, %21 : vector<8x32xf32>
    %45 = arith.mulf %32, %38 : vector<8x32xf32>
    %46 = arith.addf %44, %45 : vector<8x32xf32>
    %47 = math.tanh %46 : vector<8x32xf32>
    %48 = arith.mulf %43, %47 : vector<8x32xf32>
    %cst_33 = arith.constant dense<0.000000e+00> : vector<8x128xf32>
    %49 = tpu.matmul %48, %12, %cst_33 {dimension_numbers = #tpu.dot_dimension_numbers<[1], [0], [0], [1], [0, 0, 1, 1], [], []>} : vector<8x32xf32>, vector<32x128xf32>, vector<8x128xf32> -> vector<8x128xf32>
    %cst_34 = arith.constant dense<0.000000e+00> : vector<8x128xf32>
    %50 = tpu.matmul %19, %13, %cst_34 {dimension_numbers = #tpu.dot_dimension_numbers<[1], [0], [0], [1], [0, 0, 1, 1], [], []>} : vector<8x32xf32>, vector<32x128xf32>, vector<8x128xf32> -> vector<8x128xf32>
    %51 = arith.addf %49, %50 : vector<8x128xf32>
    %52 = vector.broadcast %15 : vector<1x128xf32> to vector<8x128xf32>
    %53 = arith.addf %51, %52 : vector<8x128xf32>
    %54 = math.tanh %53 : vector<8x128xf32>
    %55 = vector.extract_strided_slice %54 {offsets = [0, 0], sizes = [8, 32], strides = [1, 1]} : vector<8x128xf32> to vector<8x32xf32>
    %cst_35 = arith.constant 1.000000e+00 : f32
    %56 = vector.broadcast %cst_35 : f32 to vector<8x32xf32>
    %57 = arith.addf %55, %56 : vector<8x32xf32>
    %cst_36 = arith.constant 5.000000e-01 : f32
    %58 = vector.broadcast %cst_36 : f32 to vector<8x32xf32>
    %59 = arith.mulf %58, %57 : vector<8x32xf32>
    %60 = vector.extract_strided_slice %54 {offsets = [0, 32], sizes = [8, 32], strides = [1, 1]} : vector<8x128xf32> to vector<8x32xf32>
    %cst_37 = arith.constant 1.000000e+00 : f32
    %61 = vector.broadcast %cst_37 : f32 to vector<8x32xf32>
    %62 = arith.addf %60, %61 : vector<8x32xf32>
    %cst_38 = arith.constant 5.000000e-01 : f32
    %63 = vector.broadcast %cst_38 : f32 to vector<8x32xf32>
    %64 = arith.mulf %63, %62 : vector<8x32xf32>
    %65 = vector.extract_strided_slice %54 {offsets = [0, 64], sizes = [8, 32], strides = [1, 1]} : vector<8x128xf32> to vector<8x32xf32>
    %66 = vector.extract_strided_slice %54 {offsets = [0, 96], sizes = [8, 32], strides = [1, 1]} : vector<8x128xf32> to vector<8x32xf32>
    %cst_39 = arith.constant 1.000000e+00 : f32
    %67 = vector.broadcast %cst_39 : f32 to vector<8x32xf32>
    %68 = arith.addf %66, %67 : vector<8x32xf32>
    %cst_40 = arith.constant 5.000000e-01 : f32
    %69 = vector.broadcast %cst_40 : f32 to vector<8x32xf32>
    %70 = arith.mulf %69, %68 : vector<8x32xf32>
    %71 = arith.mulf %64, %23 : vector<8x32xf32>
    %72 = arith.mulf %59, %65 : vector<8x32xf32>
    %73 = arith.addf %71, %72 : vector<8x32xf32>
    %74 = math.tanh %73 : vector<8x32xf32>
    %75 = arith.mulf %70, %74 : vector<8x32xf32>
    %76 = vector.extract_strided_slice %6 {offsets = [8, 0], sizes = [8, 128], strides = [1, 1]} : vector<64x128xf32> to vector<8x128xf32>
    %cst_41 = arith.constant dense<0.000000e+00> : vector<8x128xf32>
    %77 = tpu.matmul %48, %9, %cst_41 {dimension_numbers = #tpu.dot_dimension_numbers<[1], [0], [0], [1], [0, 0, 1, 1], [], []>} : vector<8x32xf32>, vector<32x128xf32>, vector<8x128xf32> -> vector<8x128xf32>
    %78 = arith.addf %76, %77 : vector<8x128xf32>
    %79 = math.tanh %78 : vector<8x128xf32>
    %80 = vector.extract_strided_slice %79 {offsets = [0, 0], sizes = [8, 32], strides = [1, 1]} : vector<8x128xf32> to vector<8x32xf32>
    %cst_42 = arith.constant 1.000000e+00 : f32
    %81 = vector.broadcast %cst_42 : f32 to vector<8x32xf32>
    %82 = arith.addf %80, %81 : vector<8x32xf32>
    %cst_43 = arith.constant 5.000000e-01 : f32
    %83 = vector.broadcast %cst_43 : f32 to vector<8x32xf32>
    %84 = arith.mulf %83, %82 : vector<8x32xf32>
    %85 = vector.extract_strided_slice %79 {offsets = [0, 32], sizes = [8, 32], strides = [1, 1]} : vector<8x128xf32> to vector<8x32xf32>
    %cst_44 = arith.constant 1.000000e+00 : f32
    %86 = vector.broadcast %cst_44 : f32 to vector<8x32xf32>
    %87 = arith.addf %85, %86 : vector<8x32xf32>
    %cst_45 = arith.constant 5.000000e-01 : f32
    %88 = vector.broadcast %cst_45 : f32 to vector<8x32xf32>
    %89 = arith.mulf %88, %87 : vector<8x32xf32>
    %90 = vector.extract_strided_slice %79 {offsets = [0, 64], sizes = [8, 32], strides = [1, 1]} : vector<8x128xf32> to vector<8x32xf32>
    %91 = vector.extract_strided_slice %79 {offsets = [0, 96], sizes = [8, 32], strides = [1, 1]} : vector<8x128xf32> to vector<8x32xf32>
    %cst_46 = arith.constant 1.000000e+00 : f32
    %92 = vector.broadcast %cst_46 : f32 to vector<8x32xf32>
    %93 = arith.addf %91, %92 : vector<8x32xf32>
    %cst_47 = arith.constant 5.000000e-01 : f32
    %94 = vector.broadcast %cst_47 : f32 to vector<8x32xf32>
    %95 = arith.mulf %94, %93 : vector<8x32xf32>
    %96 = arith.mulf %89, %46 : vector<8x32xf32>
    %97 = arith.mulf %84, %90 : vector<8x32xf32>
    %98 = arith.addf %96, %97 : vector<8x32xf32>
    %99 = math.tanh %98 : vector<8x32xf32>
    %100 = arith.mulf %95, %99 : vector<8x32xf32>
    %cst_48 = arith.constant dense<0.000000e+00> : vector<8x128xf32>
    %101 = tpu.matmul %100, %12, %cst_48 {dimension_numbers = #tpu.dot_dimension_numbers<[1], [0], [0], [1], [0, 0, 1, 1], [], []>} : vector<8x32xf32>, vector<32x128xf32>, vector<8x128xf32> -> vector<8x128xf32>
    %cst_49 = arith.constant dense<0.000000e+00> : vector<8x128xf32>
    %102 = tpu.matmul %75, %13, %cst_49 {dimension_numbers = #tpu.dot_dimension_numbers<[1], [0], [0], [1], [0, 0, 1, 1], [], []>} : vector<8x32xf32>, vector<32x128xf32>, vector<8x128xf32> -> vector<8x128xf32>
    %103 = arith.addf %101, %102 : vector<8x128xf32>
    %104 = vector.broadcast %15 : vector<1x128xf32> to vector<8x128xf32>
    %105 = arith.addf %103, %104 : vector<8x128xf32>
    %106 = math.tanh %105 : vector<8x128xf32>
    %107 = vector.extract_strided_slice %106 {offsets = [0, 0], sizes = [8, 32], strides = [1, 1]} : vector<8x128xf32> to vector<8x32xf32>
    %cst_50 = arith.constant 1.000000e+00 : f32
    %108 = vector.broadcast %cst_50 : f32 to vector<8x32xf32>
    %109 = arith.addf %107, %108 : vector<8x32xf32>
    %cst_51 = arith.constant 5.000000e-01 : f32
    %110 = vector.broadcast %cst_51 : f32 to vector<8x32xf32>
    %111 = arith.mulf %110, %109 : vector<8x32xf32>
    %112 = vector.extract_strided_slice %106 {offsets = [0, 32], sizes = [8, 32], strides = [1, 1]} : vector<8x128xf32> to vector<8x32xf32>
    %cst_52 = arith.constant 1.000000e+00 : f32
    %113 = vector.broadcast %cst_52 : f32 to vector<8x32xf32>
    %114 = arith.addf %112, %113 : vector<8x32xf32>
    %cst_53 = arith.constant 5.000000e-01 : f32
    %115 = vector.broadcast %cst_53 : f32 to vector<8x32xf32>
    %116 = arith.mulf %115, %114 : vector<8x32xf32>
    %117 = vector.extract_strided_slice %106 {offsets = [0, 64], sizes = [8, 32], strides = [1, 1]} : vector<8x128xf32> to vector<8x32xf32>
    %118 = vector.extract_strided_slice %106 {offsets = [0, 96], sizes = [8, 32], strides = [1, 1]} : vector<8x128xf32> to vector<8x32xf32>
    %cst_54 = arith.constant 1.000000e+00 : f32
    %119 = vector.broadcast %cst_54 : f32 to vector<8x32xf32>
    %120 = arith.addf %118, %119 : vector<8x32xf32>
    %cst_55 = arith.constant 5.000000e-01 : f32
    %121 = vector.broadcast %cst_55 : f32 to vector<8x32xf32>
    %122 = arith.mulf %121, %120 : vector<8x32xf32>
    %123 = arith.mulf %116, %73 : vector<8x32xf32>
    %124 = arith.mulf %111, %117 : vector<8x32xf32>
    %125 = arith.addf %123, %124 : vector<8x32xf32>
    %126 = math.tanh %125 : vector<8x32xf32>
    %127 = arith.mulf %122, %126 : vector<8x32xf32>
    %128 = vector.extract_strided_slice %6 {offsets = [16, 0], sizes = [8, 128], strides = [1, 1]} : vector<64x128xf32> to vector<8x128xf32>
    %cst_56 = arith.constant dense<0.000000e+00> : vector<8x128xf32>
    %129 = tpu.matmul %100, %9, %cst_56 {dimension_numbers = #tpu.dot_dimension_numbers<[1], [0], [0], [1], [0, 0, 1, 1], [], []>} : vector<8x32xf32>, vector<32x128xf32>, vector<8x128xf32> -> vector<8x128xf32>
    %130 = arith.addf %128, %129 : vector<8x128xf32>
    %131 = math.tanh %130 : vector<8x128xf32>
    %132 = vector.extract_strided_slice %131 {offsets = [0, 0], sizes = [8, 32], strides = [1, 1]} : vector<8x128xf32> to vector<8x32xf32>
    %cst_57 = arith.constant 1.000000e+00 : f32
    %133 = vector.broadcast %cst_57 : f32 to vector<8x32xf32>
    %134 = arith.addf %132, %133 : vector<8x32xf32>
    %cst_58 = arith.constant 5.000000e-01 : f32
    %135 = vector.broadcast %cst_58 : f32 to vector<8x32xf32>
    %136 = arith.mulf %135, %134 : vector<8x32xf32>
    %137 = vector.extract_strided_slice %131 {offsets = [0, 32], sizes = [8, 32], strides = [1, 1]} : vector<8x128xf32> to vector<8x32xf32>
    %cst_59 = arith.constant 1.000000e+00 : f32
    %138 = vector.broadcast %cst_59 : f32 to vector<8x32xf32>
    %139 = arith.addf %137, %138 : vector<8x32xf32>
    %cst_60 = arith.constant 5.000000e-01 : f32
    %140 = vector.broadcast %cst_60 : f32 to vector<8x32xf32>
    %141 = arith.mulf %140, %139 : vector<8x32xf32>
    %142 = vector.extract_strided_slice %131 {offsets = [0, 64], sizes = [8, 32], strides = [1, 1]} : vector<8x128xf32> to vector<8x32xf32>
    %143 = vector.extract_strided_slice %131 {offsets = [0, 96], sizes = [8, 32], strides = [1, 1]} : vector<8x128xf32> to vector<8x32xf32>
    %cst_61 = arith.constant 1.000000e+00 : f32
    %144 = vector.broadcast %cst_61 : f32 to vector<8x32xf32>
    %145 = arith.addf %143, %144 : vector<8x32xf32>
    %cst_62 = arith.constant 5.000000e-01 : f32
    %146 = vector.broadcast %cst_62 : f32 to vector<8x32xf32>
    %147 = arith.mulf %146, %145 : vector<8x32xf32>
    %148 = arith.mulf %141, %98 : vector<8x32xf32>
    %149 = arith.mulf %136, %142 : vector<8x32xf32>
    %150 = arith.addf %148, %149 : vector<8x32xf32>
    %151 = math.tanh %150 : vector<8x32xf32>
    %152 = arith.mulf %147, %151 : vector<8x32xf32>
    %cst_63 = arith.constant dense<0.000000e+00> : vector<8x128xf32>
    %153 = tpu.matmul %152, %12, %cst_63 {dimension_numbers = #tpu.dot_dimension_numbers<[1], [0], [0], [1], [0, 0, 1, 1], [], []>} : vector<8x32xf32>, vector<32x128xf32>, vector<8x128xf32> -> vector<8x128xf32>
    %cst_64 = arith.constant dense<0.000000e+00> : vector<8x128xf32>
    %154 = tpu.matmul %127, %13, %cst_64 {dimension_numbers = #tpu.dot_dimension_numbers<[1], [0], [0], [1], [0, 0, 1, 1], [], []>} : vector<8x32xf32>, vector<32x128xf32>, vector<8x128xf32> -> vector<8x128xf32>
    %155 = arith.addf %153, %154 : vector<8x128xf32>
    %156 = vector.broadcast %15 : vector<1x128xf32> to vector<8x128xf32>
    %157 = arith.addf %155, %156 : vector<8x128xf32>
    %158 = math.tanh %157 : vector<8x128xf32>
    %159 = vector.extract_strided_slice %158 {offsets = [0, 0], sizes = [8, 32], strides = [1, 1]} : vector<8x128xf32> to vector<8x32xf32>
    %cst_65 = arith.constant 1.000000e+00 : f32
    %160 = vector.broadcast %cst_65 : f32 to vector<8x32xf32>
    %161 = arith.addf %159, %160 : vector<8x32xf32>
    %cst_66 = arith.constant 5.000000e-01 : f32
    %162 = vector.broadcast %cst_66 : f32 to vector<8x32xf32>
    %163 = arith.mulf %162, %161 : vector<8x32xf32>
    %164 = vector.extract_strided_slice %158 {offsets = [0, 32], sizes = [8, 32], strides = [1, 1]} : vector<8x128xf32> to vector<8x32xf32>
    %cst_67 = arith.constant 1.000000e+00 : f32
    %165 = vector.broadcast %cst_67 : f32 to vector<8x32xf32>
    %166 = arith.addf %164, %165 : vector<8x32xf32>
    %cst_68 = arith.constant 5.000000e-01 : f32
    %167 = vector.broadcast %cst_68 : f32 to vector<8x32xf32>
    %168 = arith.mulf %167, %166 : vector<8x32xf32>
    %169 = vector.extract_strided_slice %158 {offsets = [0, 64], sizes = [8, 32], strides = [1, 1]} : vector<8x128xf32> to vector<8x32xf32>
    %170 = vector.extract_strided_slice %158 {offsets = [0, 96], sizes = [8, 32], strides = [1, 1]} : vector<8x128xf32> to vector<8x32xf32>
    %cst_69 = arith.constant 1.000000e+00 : f32
    %171 = vector.broadcast %cst_69 : f32 to vector<8x32xf32>
    %172 = arith.addf %170, %171 : vector<8x32xf32>
    %cst_70 = arith.constant 5.000000e-01 : f32
    %173 = vector.broadcast %cst_70 : f32 to vector<8x32xf32>
    %174 = arith.mulf %173, %172 : vector<8x32xf32>
    %175 = arith.mulf %168, %125 : vector<8x32xf32>
    %176 = arith.mulf %163, %169 : vector<8x32xf32>
    %177 = arith.addf %175, %176 : vector<8x32xf32>
    %178 = math.tanh %177 : vector<8x32xf32>
    %179 = arith.mulf %174, %178 : vector<8x32xf32>
    %180 = vector.extract_strided_slice %6 {offsets = [24, 0], sizes = [8, 128], strides = [1, 1]} : vector<64x128xf32> to vector<8x128xf32>
    %cst_71 = arith.constant dense<0.000000e+00> : vector<8x128xf32>
    %181 = tpu.matmul %152, %9, %cst_71 {dimension_numbers = #tpu.dot_dimension_numbers<[1], [0], [0], [1], [0, 0, 1, 1], [], []>} : vector<8x32xf32>, vector<32x128xf32>, vector<8x128xf32> -> vector<8x128xf32>
    %182 = arith.addf %180, %181 : vector<8x128xf32>
    %183 = math.tanh %182 : vector<8x128xf32>
    %184 = vector.extract_strided_slice %183 {offsets = [0, 0], sizes = [8, 32], strides = [1, 1]} : vector<8x128xf32> to vector<8x32xf32>
    %cst_72 = arith.constant 1.000000e+00 : f32
    %185 = vector.broadcast %cst_72 : f32 to vector<8x32xf32>
    %186 = arith.addf %184, %185 : vector<8x32xf32>
    %cst_73 = arith.constant 5.000000e-01 : f32
    %187 = vector.broadcast %cst_73 : f32 to vector<8x32xf32>
    %188 = arith.mulf %187, %186 : vector<8x32xf32>
    %189 = vector.extract_strided_slice %183 {offsets = [0, 32], sizes = [8, 32], strides = [1, 1]} : vector<8x128xf32> to vector<8x32xf32>
    %cst_74 = arith.constant 1.000000e+00 : f32
    %190 = vector.broadcast %cst_74 : f32 to vector<8x32xf32>
    %191 = arith.addf %189, %190 : vector<8x32xf32>
    %cst_75 = arith.constant 5.000000e-01 : f32
    %192 = vector.broadcast %cst_75 : f32 to vector<8x32xf32>
    %193 = arith.mulf %192, %191 : vector<8x32xf32>
    %194 = vector.extract_strided_slice %183 {offsets = [0, 64], sizes = [8, 32], strides = [1, 1]} : vector<8x128xf32> to vector<8x32xf32>
    %195 = vector.extract_strided_slice %183 {offsets = [0, 96], sizes = [8, 32], strides = [1, 1]} : vector<8x128xf32> to vector<8x32xf32>
    %cst_76 = arith.constant 1.000000e+00 : f32
    %196 = vector.broadcast %cst_76 : f32 to vector<8x32xf32>
    %197 = arith.addf %195, %196 : vector<8x32xf32>
    %cst_77 = arith.constant 5.000000e-01 : f32
    %198 = vector.broadcast %cst_77 : f32 to vector<8x32xf32>
    %199 = arith.mulf %198, %197 : vector<8x32xf32>
    %200 = arith.mulf %193, %150 : vector<8x32xf32>
    %201 = arith.mulf %188, %194 : vector<8x32xf32>
    %202 = arith.addf %200, %201 : vector<8x32xf32>
    %203 = math.tanh %202 : vector<8x32xf32>
    %204 = arith.mulf %199, %203 : vector<8x32xf32>
    %cst_78 = arith.constant dense<0.000000e+00> : vector<8x128xf32>
    %205 = tpu.matmul %204, %12, %cst_78 {dimension_numbers = #tpu.dot_dimension_numbers<[1], [0], [0], [1], [0, 0, 1, 1], [], []>} : vector<8x32xf32>, vector<32x128xf32>, vector<8x128xf32> -> vector<8x128xf32>
    %cst_79 = arith.constant dense<0.000000e+00> : vector<8x128xf32>
    %206 = tpu.matmul %179, %13, %cst_79 {dimension_numbers = #tpu.dot_dimension_numbers<[1], [0], [0], [1], [0, 0, 1, 1], [], []>} : vector<8x32xf32>, vector<32x128xf32>, vector<8x128xf32> -> vector<8x128xf32>
    %207 = arith.addf %205, %206 : vector<8x128xf32>
    %208 = vector.broadcast %15 : vector<1x128xf32> to vector<8x128xf32>
    %209 = arith.addf %207, %208 : vector<8x128xf32>
    %210 = math.tanh %209 : vector<8x128xf32>
    %211 = vector.extract_strided_slice %210 {offsets = [0, 0], sizes = [8, 32], strides = [1, 1]} : vector<8x128xf32> to vector<8x32xf32>
    %cst_80 = arith.constant 1.000000e+00 : f32
    %212 = vector.broadcast %cst_80 : f32 to vector<8x32xf32>
    %213 = arith.addf %211, %212 : vector<8x32xf32>
    %cst_81 = arith.constant 5.000000e-01 : f32
    %214 = vector.broadcast %cst_81 : f32 to vector<8x32xf32>
    %215 = arith.mulf %214, %213 : vector<8x32xf32>
    %216 = vector.extract_strided_slice %210 {offsets = [0, 32], sizes = [8, 32], strides = [1, 1]} : vector<8x128xf32> to vector<8x32xf32>
    %cst_82 = arith.constant 1.000000e+00 : f32
    %217 = vector.broadcast %cst_82 : f32 to vector<8x32xf32>
    %218 = arith.addf %216, %217 : vector<8x32xf32>
    %cst_83 = arith.constant 5.000000e-01 : f32
    %219 = vector.broadcast %cst_83 : f32 to vector<8x32xf32>
    %220 = arith.mulf %219, %218 : vector<8x32xf32>
    %221 = vector.extract_strided_slice %210 {offsets = [0, 64], sizes = [8, 32], strides = [1, 1]} : vector<8x128xf32> to vector<8x32xf32>
    %222 = vector.extract_strided_slice %210 {offsets = [0, 96], sizes = [8, 32], strides = [1, 1]} : vector<8x128xf32> to vector<8x32xf32>
    %cst_84 = arith.constant 1.000000e+00 : f32
    %223 = vector.broadcast %cst_84 : f32 to vector<8x32xf32>
    %224 = arith.addf %222, %223 : vector<8x32xf32>
    %cst_85 = arith.constant 5.000000e-01 : f32
    %225 = vector.broadcast %cst_85 : f32 to vector<8x32xf32>
    %226 = arith.mulf %225, %224 : vector<8x32xf32>
    %227 = arith.mulf %220, %177 : vector<8x32xf32>
    %228 = arith.mulf %215, %221 : vector<8x32xf32>
    %229 = arith.addf %227, %228 : vector<8x32xf32>
    %230 = math.tanh %229 : vector<8x32xf32>
    %231 = arith.mulf %226, %230 : vector<8x32xf32>
    %232 = vector.extract_strided_slice %6 {offsets = [32, 0], sizes = [8, 128], strides = [1, 1]} : vector<64x128xf32> to vector<8x128xf32>
    %cst_86 = arith.constant dense<0.000000e+00> : vector<8x128xf32>
    %233 = tpu.matmul %204, %9, %cst_86 {dimension_numbers = #tpu.dot_dimension_numbers<[1], [0], [0], [1], [0, 0, 1, 1], [], []>} : vector<8x32xf32>, vector<32x128xf32>, vector<8x128xf32> -> vector<8x128xf32>
    %234 = arith.addf %232, %233 : vector<8x128xf32>
    %235 = math.tanh %234 : vector<8x128xf32>
    %236 = vector.extract_strided_slice %235 {offsets = [0, 0], sizes = [8, 32], strides = [1, 1]} : vector<8x128xf32> to vector<8x32xf32>
    %cst_87 = arith.constant 1.000000e+00 : f32
    %237 = vector.broadcast %cst_87 : f32 to vector<8x32xf32>
    %238 = arith.addf %236, %237 : vector<8x32xf32>
    %cst_88 = arith.constant 5.000000e-01 : f32
    %239 = vector.broadcast %cst_88 : f32 to vector<8x32xf32>
    %240 = arith.mulf %239, %238 : vector<8x32xf32>
    %241 = vector.extract_strided_slice %235 {offsets = [0, 32], sizes = [8, 32], strides = [1, 1]} : vector<8x128xf32> to vector<8x32xf32>
    %cst_89 = arith.constant 1.000000e+00 : f32
    %242 = vector.broadcast %cst_89 : f32 to vector<8x32xf32>
    %243 = arith.addf %241, %242 : vector<8x32xf32>
    %cst_90 = arith.constant 5.000000e-01 : f32
    %244 = vector.broadcast %cst_90 : f32 to vector<8x32xf32>
    %245 = arith.mulf %244, %243 : vector<8x32xf32>
    %246 = vector.extract_strided_slice %235 {offsets = [0, 64], sizes = [8, 32], strides = [1, 1]} : vector<8x128xf32> to vector<8x32xf32>
    %247 = vector.extract_strided_slice %235 {offsets = [0, 96], sizes = [8, 32], strides = [1, 1]} : vector<8x128xf32> to vector<8x32xf32>
    %cst_91 = arith.constant 1.000000e+00 : f32
    %248 = vector.broadcast %cst_91 : f32 to vector<8x32xf32>
    %249 = arith.addf %247, %248 : vector<8x32xf32>
    %cst_92 = arith.constant 5.000000e-01 : f32
    %250 = vector.broadcast %cst_92 : f32 to vector<8x32xf32>
    %251 = arith.mulf %250, %249 : vector<8x32xf32>
    %252 = arith.mulf %245, %202 : vector<8x32xf32>
    %253 = arith.mulf %240, %246 : vector<8x32xf32>
    %254 = arith.addf %252, %253 : vector<8x32xf32>
    %255 = math.tanh %254 : vector<8x32xf32>
    %256 = arith.mulf %251, %255 : vector<8x32xf32>
    %cst_93 = arith.constant dense<0.000000e+00> : vector<8x128xf32>
    %257 = tpu.matmul %256, %12, %cst_93 {dimension_numbers = #tpu.dot_dimension_numbers<[1], [0], [0], [1], [0, 0, 1, 1], [], []>} : vector<8x32xf32>, vector<32x128xf32>, vector<8x128xf32> -> vector<8x128xf32>
    %cst_94 = arith.constant dense<0.000000e+00> : vector<8x128xf32>
    %258 = tpu.matmul %231, %13, %cst_94 {dimension_numbers = #tpu.dot_dimension_numbers<[1], [0], [0], [1], [0, 0, 1, 1], [], []>} : vector<8x32xf32>, vector<32x128xf32>, vector<8x128xf32> -> vector<8x128xf32>
    %259 = arith.addf %257, %258 : vector<8x128xf32>
    %260 = vector.broadcast %15 : vector<1x128xf32> to vector<8x128xf32>
    %261 = arith.addf %259, %260 : vector<8x128xf32>
    %262 = math.tanh %261 : vector<8x128xf32>
    %263 = vector.extract_strided_slice %262 {offsets = [0, 0], sizes = [8, 32], strides = [1, 1]} : vector<8x128xf32> to vector<8x32xf32>
    %cst_95 = arith.constant 1.000000e+00 : f32
    %264 = vector.broadcast %cst_95 : f32 to vector<8x32xf32>
    %265 = arith.addf %263, %264 : vector<8x32xf32>
    %cst_96 = arith.constant 5.000000e-01 : f32
    %266 = vector.broadcast %cst_96 : f32 to vector<8x32xf32>
    %267 = arith.mulf %266, %265 : vector<8x32xf32>
    %268 = vector.extract_strided_slice %262 {offsets = [0, 32], sizes = [8, 32], strides = [1, 1]} : vector<8x128xf32> to vector<8x32xf32>
    %cst_97 = arith.constant 1.000000e+00 : f32
    %269 = vector.broadcast %cst_97 : f32 to vector<8x32xf32>
    %270 = arith.addf %268, %269 : vector<8x32xf32>
    %cst_98 = arith.constant 5.000000e-01 : f32
    %271 = vector.broadcast %cst_98 : f32 to vector<8x32xf32>
    %272 = arith.mulf %271, %270 : vector<8x32xf32>
    %273 = vector.extract_strided_slice %262 {offsets = [0, 64], sizes = [8, 32], strides = [1, 1]} : vector<8x128xf32> to vector<8x32xf32>
    %274 = vector.extract_strided_slice %262 {offsets = [0, 96], sizes = [8, 32], strides = [1, 1]} : vector<8x128xf32> to vector<8x32xf32>
    %cst_99 = arith.constant 1.000000e+00 : f32
    %275 = vector.broadcast %cst_99 : f32 to vector<8x32xf32>
    %276 = arith.addf %274, %275 : vector<8x32xf32>
    %cst_100 = arith.constant 5.000000e-01 : f32
    %277 = vector.broadcast %cst_100 : f32 to vector<8x32xf32>
    %278 = arith.mulf %277, %276 : vector<8x32xf32>
    %279 = arith.mulf %272, %229 : vector<8x32xf32>
    %280 = arith.mulf %267, %273 : vector<8x32xf32>
    %281 = arith.addf %279, %280 : vector<8x32xf32>
    %282 = math.tanh %281 : vector<8x32xf32>
    %283 = arith.mulf %278, %282 : vector<8x32xf32>
    %284 = vector.extract_strided_slice %6 {offsets = [40, 0], sizes = [8, 128], strides = [1, 1]} : vector<64x128xf32> to vector<8x128xf32>
    %cst_101 = arith.constant dense<0.000000e+00> : vector<8x128xf32>
    %285 = tpu.matmul %256, %9, %cst_101 {dimension_numbers = #tpu.dot_dimension_numbers<[1], [0], [0], [1], [0, 0, 1, 1], [], []>} : vector<8x32xf32>, vector<32x128xf32>, vector<8x128xf32> -> vector<8x128xf32>
    %286 = arith.addf %284, %285 : vector<8x128xf32>
    %287 = math.tanh %286 : vector<8x128xf32>
    %288 = vector.extract_strided_slice %287 {offsets = [0, 0], sizes = [8, 32], strides = [1, 1]} : vector<8x128xf32> to vector<8x32xf32>
    %cst_102 = arith.constant 1.000000e+00 : f32
    %289 = vector.broadcast %cst_102 : f32 to vector<8x32xf32>
    %290 = arith.addf %288, %289 : vector<8x32xf32>
    %cst_103 = arith.constant 5.000000e-01 : f32
    %291 = vector.broadcast %cst_103 : f32 to vector<8x32xf32>
    %292 = arith.mulf %291, %290 : vector<8x32xf32>
    %293 = vector.extract_strided_slice %287 {offsets = [0, 32], sizes = [8, 32], strides = [1, 1]} : vector<8x128xf32> to vector<8x32xf32>
    %cst_104 = arith.constant 1.000000e+00 : f32
    %294 = vector.broadcast %cst_104 : f32 to vector<8x32xf32>
    %295 = arith.addf %293, %294 : vector<8x32xf32>
    %cst_105 = arith.constant 5.000000e-01 : f32
    %296 = vector.broadcast %cst_105 : f32 to vector<8x32xf32>
    %297 = arith.mulf %296, %295 : vector<8x32xf32>
    %298 = vector.extract_strided_slice %287 {offsets = [0, 64], sizes = [8, 32], strides = [1, 1]} : vector<8x128xf32> to vector<8x32xf32>
    %299 = vector.extract_strided_slice %287 {offsets = [0, 96], sizes = [8, 32], strides = [1, 1]} : vector<8x128xf32> to vector<8x32xf32>
    %cst_106 = arith.constant 1.000000e+00 : f32
    %300 = vector.broadcast %cst_106 : f32 to vector<8x32xf32>
    %301 = arith.addf %299, %300 : vector<8x32xf32>
    %cst_107 = arith.constant 5.000000e-01 : f32
    %302 = vector.broadcast %cst_107 : f32 to vector<8x32xf32>
    %303 = arith.mulf %302, %301 : vector<8x32xf32>
    %304 = arith.mulf %297, %254 : vector<8x32xf32>
    %305 = arith.mulf %292, %298 : vector<8x32xf32>
    %306 = arith.addf %304, %305 : vector<8x32xf32>
    %307 = math.tanh %306 : vector<8x32xf32>
    %308 = arith.mulf %303, %307 : vector<8x32xf32>
    %cst_108 = arith.constant dense<0.000000e+00> : vector<8x128xf32>
    %309 = tpu.matmul %308, %12, %cst_108 {dimension_numbers = #tpu.dot_dimension_numbers<[1], [0], [0], [1], [0, 0, 1, 1], [], []>} : vector<8x32xf32>, vector<32x128xf32>, vector<8x128xf32> -> vector<8x128xf32>
    %cst_109 = arith.constant dense<0.000000e+00> : vector<8x128xf32>
    %310 = tpu.matmul %283, %13, %cst_109 {dimension_numbers = #tpu.dot_dimension_numbers<[1], [0], [0], [1], [0, 0, 1, 1], [], []>} : vector<8x32xf32>, vector<32x128xf32>, vector<8x128xf32> -> vector<8x128xf32>
    %311 = arith.addf %309, %310 : vector<8x128xf32>
    %312 = vector.broadcast %15 : vector<1x128xf32> to vector<8x128xf32>
    %313 = arith.addf %311, %312 : vector<8x128xf32>
    %314 = math.tanh %313 : vector<8x128xf32>
    %315 = vector.extract_strided_slice %314 {offsets = [0, 0], sizes = [8, 32], strides = [1, 1]} : vector<8x128xf32> to vector<8x32xf32>
    %cst_110 = arith.constant 1.000000e+00 : f32
    %316 = vector.broadcast %cst_110 : f32 to vector<8x32xf32>
    %317 = arith.addf %315, %316 : vector<8x32xf32>
    %cst_111 = arith.constant 5.000000e-01 : f32
    %318 = vector.broadcast %cst_111 : f32 to vector<8x32xf32>
    %319 = arith.mulf %318, %317 : vector<8x32xf32>
    %320 = vector.extract_strided_slice %314 {offsets = [0, 32], sizes = [8, 32], strides = [1, 1]} : vector<8x128xf32> to vector<8x32xf32>
    %cst_112 = arith.constant 1.000000e+00 : f32
    %321 = vector.broadcast %cst_112 : f32 to vector<8x32xf32>
    %322 = arith.addf %320, %321 : vector<8x32xf32>
    %cst_113 = arith.constant 5.000000e-01 : f32
    %323 = vector.broadcast %cst_113 : f32 to vector<8x32xf32>
    %324 = arith.mulf %323, %322 : vector<8x32xf32>
    %325 = vector.extract_strided_slice %314 {offsets = [0, 64], sizes = [8, 32], strides = [1, 1]} : vector<8x128xf32> to vector<8x32xf32>
    %326 = vector.extract_strided_slice %314 {offsets = [0, 96], sizes = [8, 32], strides = [1, 1]} : vector<8x128xf32> to vector<8x32xf32>
    %cst_114 = arith.constant 1.000000e+00 : f32
    %327 = vector.broadcast %cst_114 : f32 to vector<8x32xf32>
    %328 = arith.addf %326, %327 : vector<8x32xf32>
    %cst_115 = arith.constant 5.000000e-01 : f32
    %329 = vector.broadcast %cst_115 : f32 to vector<8x32xf32>
    %330 = arith.mulf %329, %328 : vector<8x32xf32>
    %331 = arith.mulf %324, %281 : vector<8x32xf32>
    %332 = arith.mulf %319, %325 : vector<8x32xf32>
    %333 = arith.addf %331, %332 : vector<8x32xf32>
    %334 = math.tanh %333 : vector<8x32xf32>
    %335 = arith.mulf %330, %334 : vector<8x32xf32>
    %336 = vector.extract_strided_slice %6 {offsets = [48, 0], sizes = [8, 128], strides = [1, 1]} : vector<64x128xf32> to vector<8x128xf32>
    %cst_116 = arith.constant dense<0.000000e+00> : vector<8x128xf32>
    %337 = tpu.matmul %308, %9, %cst_116 {dimension_numbers = #tpu.dot_dimension_numbers<[1], [0], [0], [1], [0, 0, 1, 1], [], []>} : vector<8x32xf32>, vector<32x128xf32>, vector<8x128xf32> -> vector<8x128xf32>
    %338 = arith.addf %336, %337 : vector<8x128xf32>
    %339 = math.tanh %338 : vector<8x128xf32>
    %340 = vector.extract_strided_slice %339 {offsets = [0, 0], sizes = [8, 32], strides = [1, 1]} : vector<8x128xf32> to vector<8x32xf32>
    %cst_117 = arith.constant 1.000000e+00 : f32
    %341 = vector.broadcast %cst_117 : f32 to vector<8x32xf32>
    %342 = arith.addf %340, %341 : vector<8x32xf32>
    %cst_118 = arith.constant 5.000000e-01 : f32
    %343 = vector.broadcast %cst_118 : f32 to vector<8x32xf32>
    %344 = arith.mulf %343, %342 : vector<8x32xf32>
    %345 = vector.extract_strided_slice %339 {offsets = [0, 32], sizes = [8, 32], strides = [1, 1]} : vector<8x128xf32> to vector<8x32xf32>
    %cst_119 = arith.constant 1.000000e+00 : f32
    %346 = vector.broadcast %cst_119 : f32 to vector<8x32xf32>
    %347 = arith.addf %345, %346 : vector<8x32xf32>
    %cst_120 = arith.constant 5.000000e-01 : f32
    %348 = vector.broadcast %cst_120 : f32 to vector<8x32xf32>
    %349 = arith.mulf %348, %347 : vector<8x32xf32>
    %350 = vector.extract_strided_slice %339 {offsets = [0, 64], sizes = [8, 32], strides = [1, 1]} : vector<8x128xf32> to vector<8x32xf32>
    %351 = vector.extract_strided_slice %339 {offsets = [0, 96], sizes = [8, 32], strides = [1, 1]} : vector<8x128xf32> to vector<8x32xf32>
    %cst_121 = arith.constant 1.000000e+00 : f32
    %352 = vector.broadcast %cst_121 : f32 to vector<8x32xf32>
    %353 = arith.addf %351, %352 : vector<8x32xf32>
    %cst_122 = arith.constant 5.000000e-01 : f32
    %354 = vector.broadcast %cst_122 : f32 to vector<8x32xf32>
    %355 = arith.mulf %354, %353 : vector<8x32xf32>
    %356 = arith.mulf %349, %306 : vector<8x32xf32>
    %357 = arith.mulf %344, %350 : vector<8x32xf32>
    %358 = arith.addf %356, %357 : vector<8x32xf32>
    %359 = math.tanh %358 : vector<8x32xf32>
    %360 = arith.mulf %355, %359 : vector<8x32xf32>
    %cst_123 = arith.constant dense<0.000000e+00> : vector<8x128xf32>
    %361 = tpu.matmul %360, %12, %cst_123 {dimension_numbers = #tpu.dot_dimension_numbers<[1], [0], [0], [1], [0, 0, 1, 1], [], []>} : vector<8x32xf32>, vector<32x128xf32>, vector<8x128xf32> -> vector<8x128xf32>
    %cst_124 = arith.constant dense<0.000000e+00> : vector<8x128xf32>
    %362 = tpu.matmul %335, %13, %cst_124 {dimension_numbers = #tpu.dot_dimension_numbers<[1], [0], [0], [1], [0, 0, 1, 1], [], []>} : vector<8x32xf32>, vector<32x128xf32>, vector<8x128xf32> -> vector<8x128xf32>
    %363 = arith.addf %361, %362 : vector<8x128xf32>
    %364 = vector.broadcast %15 : vector<1x128xf32> to vector<8x128xf32>
    %365 = arith.addf %363, %364 : vector<8x128xf32>
    %366 = math.tanh %365 : vector<8x128xf32>
    %367 = vector.extract_strided_slice %366 {offsets = [0, 0], sizes = [8, 32], strides = [1, 1]} : vector<8x128xf32> to vector<8x32xf32>
    %cst_125 = arith.constant 1.000000e+00 : f32
    %368 = vector.broadcast %cst_125 : f32 to vector<8x32xf32>
    %369 = arith.addf %367, %368 : vector<8x32xf32>
    %cst_126 = arith.constant 5.000000e-01 : f32
    %370 = vector.broadcast %cst_126 : f32 to vector<8x32xf32>
    %371 = arith.mulf %370, %369 : vector<8x32xf32>
    %372 = vector.extract_strided_slice %366 {offsets = [0, 32], sizes = [8, 32], strides = [1, 1]} : vector<8x128xf32> to vector<8x32xf32>
    %cst_127 = arith.constant 1.000000e+00 : f32
    %373 = vector.broadcast %cst_127 : f32 to vector<8x32xf32>
    %374 = arith.addf %372, %373 : vector<8x32xf32>
    %cst_128 = arith.constant 5.000000e-01 : f32
    %375 = vector.broadcast %cst_128 : f32 to vector<8x32xf32>
    %376 = arith.mulf %375, %374 : vector<8x32xf32>
    %377 = vector.extract_strided_slice %366 {offsets = [0, 64], sizes = [8, 32], strides = [1, 1]} : vector<8x128xf32> to vector<8x32xf32>
    %378 = vector.extract_strided_slice %366 {offsets = [0, 96], sizes = [8, 32], strides = [1, 1]} : vector<8x128xf32> to vector<8x32xf32>
    %cst_129 = arith.constant 1.000000e+00 : f32
    %379 = vector.broadcast %cst_129 : f32 to vector<8x32xf32>
    %380 = arith.addf %378, %379 : vector<8x32xf32>
    %cst_130 = arith.constant 5.000000e-01 : f32
    %381 = vector.broadcast %cst_130 : f32 to vector<8x32xf32>
    %382 = arith.mulf %381, %380 : vector<8x32xf32>
    %383 = arith.mulf %376, %333 : vector<8x32xf32>
    %384 = arith.mulf %371, %377 : vector<8x32xf32>
    %385 = arith.addf %383, %384 : vector<8x32xf32>
    %386 = math.tanh %385 : vector<8x32xf32>
    %387 = arith.mulf %382, %386 : vector<8x32xf32>
    %388 = vector.extract_strided_slice %6 {offsets = [56, 0], sizes = [8, 128], strides = [1, 1]} : vector<64x128xf32> to vector<8x128xf32>
    %cst_131 = arith.constant dense<0.000000e+00> : vector<8x128xf32>
    %389 = tpu.matmul %360, %9, %cst_131 {dimension_numbers = #tpu.dot_dimension_numbers<[1], [0], [0], [1], [0, 0, 1, 1], [], []>} : vector<8x32xf32>, vector<32x128xf32>, vector<8x128xf32> -> vector<8x128xf32>
    %390 = arith.addf %388, %389 : vector<8x128xf32>
    %391 = math.tanh %390 : vector<8x128xf32>
    %392 = vector.extract_strided_slice %391 {offsets = [0, 0], sizes = [8, 32], strides = [1, 1]} : vector<8x128xf32> to vector<8x32xf32>
    %cst_132 = arith.constant 1.000000e+00 : f32
    %393 = vector.broadcast %cst_132 : f32 to vector<8x32xf32>
    %394 = arith.addf %392, %393 : vector<8x32xf32>
    %cst_133 = arith.constant 5.000000e-01 : f32
    %395 = vector.broadcast %cst_133 : f32 to vector<8x32xf32>
    %396 = arith.mulf %395, %394 : vector<8x32xf32>
    %397 = vector.extract_strided_slice %391 {offsets = [0, 32], sizes = [8, 32], strides = [1, 1]} : vector<8x128xf32> to vector<8x32xf32>
    %cst_134 = arith.constant 1.000000e+00 : f32
    %398 = vector.broadcast %cst_134 : f32 to vector<8x32xf32>
    %399 = arith.addf %397, %398 : vector<8x32xf32>
    %cst_135 = arith.constant 5.000000e-01 : f32
    %400 = vector.broadcast %cst_135 : f32 to vector<8x32xf32>
    %401 = arith.mulf %400, %399 : vector<8x32xf32>
    %402 = vector.extract_strided_slice %391 {offsets = [0, 64], sizes = [8, 32], strides = [1, 1]} : vector<8x128xf32> to vector<8x32xf32>
    %403 = vector.extract_strided_slice %391 {offsets = [0, 96], sizes = [8, 32], strides = [1, 1]} : vector<8x128xf32> to vector<8x32xf32>
    %cst_136 = arith.constant 1.000000e+00 : f32
    %404 = vector.broadcast %cst_136 : f32 to vector<8x32xf32>
    %405 = arith.addf %403, %404 : vector<8x32xf32>
    %cst_137 = arith.constant 5.000000e-01 : f32
    %406 = vector.broadcast %cst_137 : f32 to vector<8x32xf32>
    %407 = arith.mulf %406, %405 : vector<8x32xf32>
    %408 = arith.mulf %401, %358 : vector<8x32xf32>
    %409 = arith.mulf %396, %402 : vector<8x32xf32>
    %410 = arith.addf %408, %409 : vector<8x32xf32>
    %411 = math.tanh %410 : vector<8x32xf32>
    %412 = arith.mulf %407, %411 : vector<8x32xf32>
    %cst_138 = arith.constant dense<0.000000e+00> : vector<8x128xf32>
    %413 = tpu.matmul %412, %12, %cst_138 {dimension_numbers = #tpu.dot_dimension_numbers<[1], [0], [0], [1], [0, 0, 1, 1], [], []>} : vector<8x32xf32>, vector<32x128xf32>, vector<8x128xf32> -> vector<8x128xf32>
    %cst_139 = arith.constant dense<0.000000e+00> : vector<8x128xf32>
    %414 = tpu.matmul %387, %13, %cst_139 {dimension_numbers = #tpu.dot_dimension_numbers<[1], [0], [0], [1], [0, 0, 1, 1], [], []>} : vector<8x32xf32>, vector<32x128xf32>, vector<8x128xf32> -> vector<8x128xf32>
    %415 = arith.addf %413, %414 : vector<8x128xf32>
    %416 = vector.broadcast %15 : vector<1x128xf32> to vector<8x128xf32>
    %417 = arith.addf %415, %416 : vector<8x128xf32>
    %418 = math.tanh %417 : vector<8x128xf32>
    %419 = vector.extract_strided_slice %418 {offsets = [0, 0], sizes = [8, 32], strides = [1, 1]} : vector<8x128xf32> to vector<8x32xf32>
    %cst_140 = arith.constant 1.000000e+00 : f32
    %420 = vector.broadcast %cst_140 : f32 to vector<8x32xf32>
    %421 = arith.addf %419, %420 : vector<8x32xf32>
    %cst_141 = arith.constant 5.000000e-01 : f32
    %422 = vector.broadcast %cst_141 : f32 to vector<8x32xf32>
    %423 = arith.mulf %422, %421 : vector<8x32xf32>
    %424 = vector.extract_strided_slice %418 {offsets = [0, 32], sizes = [8, 32], strides = [1, 1]} : vector<8x128xf32> to vector<8x32xf32>
    %cst_142 = arith.constant 1.000000e+00 : f32
    %425 = vector.broadcast %cst_142 : f32 to vector<8x32xf32>
    %426 = arith.addf %424, %425 : vector<8x32xf32>
    %cst_143 = arith.constant 5.000000e-01 : f32
    %427 = vector.broadcast %cst_143 : f32 to vector<8x32xf32>
    %428 = arith.mulf %427, %426 : vector<8x32xf32>
    %429 = vector.extract_strided_slice %418 {offsets = [0, 64], sizes = [8, 32], strides = [1, 1]} : vector<8x128xf32> to vector<8x32xf32>
    %430 = vector.extract_strided_slice %418 {offsets = [0, 96], sizes = [8, 32], strides = [1, 1]} : vector<8x128xf32> to vector<8x32xf32>
    %cst_144 = arith.constant 1.000000e+00 : f32
    %431 = vector.broadcast %cst_144 : f32 to vector<8x32xf32>
    %432 = arith.addf %430, %431 : vector<8x32xf32>
    %cst_145 = arith.constant 5.000000e-01 : f32
    %433 = vector.broadcast %cst_145 : f32 to vector<8x32xf32>
    %434 = arith.mulf %433, %432 : vector<8x32xf32>
    %435 = arith.mulf %428, %385 : vector<8x32xf32>
    %436 = arith.mulf %423, %429 : vector<8x32xf32>
    %437 = arith.addf %435, %436 : vector<8x32xf32>
    %438 = math.tanh %437 : vector<8x32xf32>
    %439 = arith.mulf %434, %438 : vector<8x32xf32>
    %c0_146 = arith.constant 0 : index
    %c0_147 = arith.constant 0 : index
    %c0_148 = arith.constant 0 : index
    %440 = vector.load %arg9[%c0_146, %c0_147, %c0_148] : memref<2x8x32xf32, #tpu.memory_space<vmem>>, vector<1x8x32xf32>
    %441 = vector.shape_cast %440 : vector<1x8x32xf32> to vector<8x32xf32>
    %442 = vector.shape_cast %412 : vector<8x32xf32> to vector<1x8x32xf32>
    tpu.vector_store %arg9[%c0_146, %c0_147, %c0_148], %442 {strides = array<i32>} : memref<2x8x32xf32, #tpu.memory_space<vmem>>, vector<1x8x32xf32>,
    %c0_149 = arith.constant 0 : index
    %c0_150 = arith.constant 0 : index
    %c0_151 = arith.constant 0 : index
    %443 = vector.load %arg10[%c0_149, %c0_150, %c0_151] : memref<2x8x32xf32, #tpu.memory_space<vmem>>, vector<1x8x32xf32>
    %444 = vector.shape_cast %443 : vector<1x8x32xf32> to vector<8x32xf32>
    %445 = vector.shape_cast %410 : vector<8x32xf32> to vector<1x8x32xf32>
    tpu.vector_store %arg10[%c0_149, %c0_150, %c0_151], %445 {strides = array<i32>} : memref<2x8x32xf32, #tpu.memory_space<vmem>>, vector<1x8x32xf32>,
    %c1_152 = arith.constant 1 : index
    %c0_153 = arith.constant 0 : index
    %c0_154 = arith.constant 0 : index
    %446 = vector.load %arg9[%c1_152, %c0_153, %c0_154] : memref<2x8x32xf32, #tpu.memory_space<vmem>>, vector<1x8x32xf32>
    %447 = vector.shape_cast %446 : vector<1x8x32xf32> to vector<8x32xf32>
    %448 = vector.shape_cast %439 : vector<8x32xf32> to vector<1x8x32xf32>
    tpu.vector_store %arg9[%c1_152, %c0_153, %c0_154], %448 {strides = array<i32>} : memref<2x8x32xf32, #tpu.memory_space<vmem>>, vector<1x8x32xf32>,
    %c1_155 = arith.constant 1 : index
    %c0_156 = arith.constant 0 : index
    %c0_157 = arith.constant 0 : index
    %449 = vector.load %arg10[%c1_155, %c0_156, %c0_157] : memref<2x8x32xf32, #tpu.memory_space<vmem>>, vector<1x8x32xf32>
    %450 = vector.shape_cast %449 : vector<1x8x32xf32> to vector<8x32xf32>
    %451 = vector.shape_cast %437 : vector<8x32xf32> to vector<1x8x32xf32>
    tpu.vector_store %arg10[%c1_155, %c0_156, %c0_157], %451 {strides = array<i32>} : memref<2x8x32xf32, #tpu.memory_space<vmem>>, vector<1x8x32xf32>,
    %c0_158 = arith.constant 0 : index
    %c0_159 = arith.constant 0 : index
    %452 = vector.load %arg6[%c0_158, %c0_159] : memref<32x2xf32, #tpu.memory_space<vmem>>, vector<32x2xf32>
    %cst_160 = arith.constant dense<0.000000e+00> : vector<8x2xf32>
    %453 = tpu.matmul %439, %452, %cst_160 {dimension_numbers = #tpu.dot_dimension_numbers<[1], [0], [0], [1], [0, 0, 1, 1], [], []>} : vector<8x32xf32>, vector<32x2xf32>, vector<8x2xf32> -> vector<8x2xf32>
    %c0_161 = arith.constant 0 : index
    %c0_162 = arith.constant 0 : index
    %454 = vector.load %arg7[%c0_161, %c0_162] : memref<1x2xf32, #tpu.memory_space<vmem>>, vector<1x2xf32>
    %455 = vector.broadcast %454 : vector<1x2xf32> to vector<8x2xf32>
    %456 = arith.addf %453, %455 : vector<8x2xf32>
    %cst_163 = arith.constant dense<0xFF800000> : vector<8xf32>
    %457 = vector.multi_reduction <maximumf>, %456, %cst_163 [1] : vector<8x2xf32> to vector<8xf32>
    %458 = vector.shape_cast %457 : vector<8xf32> to vector<8x1xf32>
    %459 = vector.broadcast %458 : vector<8x1xf32> to vector<8x2xf32>
    %460 = arith.subf %456, %459 : vector<8x2xf32>
    %461 = math.exp %460 : vector<8x2xf32>
    %cst_164 = arith.constant dense<0.000000e+00> : vector<8xf32>
    %462 = vector.multi_reduction <add>, %461, %cst_164 [1] : vector<8x2xf32> to vector<8xf32>
    %463 = vector.shape_cast %462 : vector<8xf32> to vector<8x1xf32>
    %464 = tpu.reciprocal %463 {approx = true} : vector<8x1xf32> -> vector<8x1xf32>
    %465 = vector.broadcast %464 : vector<8x1xf32> to vector<8x2xf32>
    %466 = arith.mulf %461, %465 : vector<8x2xf32>
    %c0_165 = arith.constant 0 : index
    %c0_166 = arith.constant 0 : index
    %467 = vector.load %arg8[%c0_165, %c0_166] : memref<8x2xf32, #tpu.memory_space<vmem>>, vector<8x2xf32>
    tpu.vector_store %arg8[%c0_165, %c0_166], %466 {strides = array<i32>} : memref<8x2xf32, #tpu.memory_space<vmem>>, vector<8x2xf32>,
    return
  }
}

</mosaic_0001>

<bundles_post_ra>
// kernel: _forward_impl.1
= control target key start
LH: loop header
LB: loop body
LE: loop exit
PB: predicated region body
PF: predicated region fallthrough
CT: control target
= control target key end

     0   :  { %16 = vsyncpa [#allocation3], 0  ;;  %s3052_s13 = smov [#allocation2]   ;;  %s3723_s0 = inlined_call_operand.vmem [shape: f32[64,29], index: 0, kind: input, shape index: {}]   ;;  %s3724_s1 = inlined_call_operand.vmem [shape: f32[2,8,32], index: 1, kind: input, shape index: {}]   ;;  %s3725_s2 = inlined_call_operand.vmem [shape: f32[2,8,32], index: 2, kind: input, shape index: {}]   ;;  %s3726_s3 = inlined_call_operand.hbm [shape: f32[29,128], index: 3, kind: input, shape index: {}]   ;;  %s3727_s4 = inlined_call_operand.vmem [shape: f32[2,64,128], index: 4, kind: input, shape index: {}]   ;;  %s3728_s5 = inlined_call_operand.vmem [shape: f32[2,1,128], index: 5, kind: input, shape index: {}]   ;;  %s3729_s6 = inlined_call_operand.vmem [shape: f32[32,2], index: 6, kind: input, shape index: {}]   ;;  %s3730_s7 = inlined_call_operand.vmem [shape: f32[1,2], index: 7, kind: input, shape index: {}]   ;;  %s3731_s8 = inlined_call_operand.vmem [shape: f32[8,2], index: 8, kind: output, shape index: {0}]   ;;  %s3732_s9 = inlined_call_operand.vmem [shape: f32[2,8,32], index: 9, kind: output, shape index: {1}]   ;;  %s3733_s10 = inlined_call_operand.vmem [shape: f32[2,8,32], index: 10, kind: output, shape index: {2}]  }
   0x1   :  { %s28_s14 = sshll.u32 %s3052_s13, 4  ;;  %s29_s14 = int_to_ptr.vmem [resolvable:$true] %s28_s14 }
   0x2   :  { %s3038_s15 = scalar_lea.vmem %s29_s14, 512  ;;  %p3043_p1 = scmp.lt.s32.totalorder %s29_s14, %s29_s14 }
   0x3   :  { %p3039_p0 = scmp.ne.s32.totalorder %s29_s14, %s3038_s15  ;;  %p3044_p2 = scmp.lt.s32.totalorder %s3038_s15, %s3038_s15 }
   0x5   :  { %p3045_p3 = por %p3044_p2, %p3043_p1 }
   0x7   :  { %p3046_p4 = pnand %p3045_p3, %p3039_p0 }
   0x9   :  { %3049 = shalt.err (!%p3046_p4)
}
   0xa   :  { %s3053_s16 = smov 128   ;;  %s3054_s17 = smov 8  }
   0xb   :  { %34 = dma.hbm_to_vmem [thread:$0]  %s3726_s3, 512, %s29_s14, [#allocation3], %s3053_s16, %s3053_s16, %s3054_s17  }
   0xc   :  { %3050 = dma.done.wait [#allocation3], 512  }
   0xd   :  { %3051 = vsyncadd [#allocation3], 4294966784  ;;  %v3055_v0 = vmov 0.0   ;;  %vm3056_vm0 = vmmov 0   ;;  %vm90_vm1 = vcmask 1044480   ;;  %v56_v2 = vld [vmem:[#allocation2 + $0x10] sm:$0xff] }
   0xe   :  { %2667 = vmatprep.subr.mxu1 %v3055_v0  ;;  %2675 = vmatprep.mubr.msk.f32.mxu1 %vm3056_vm0, %v3055_v0  ;;  %v57_v1 = vld [vmem:[#allocation2 + $0x18] sm:$0x1f]  ;;  %v3130_v4 = vld [vmem:[%s3727_s4 + $0x10] sm:$0xff]  ;;  %v55_v5 = vld [vmem:[#allocation2 + $0x8] sm:$0xff]  ;;  %vm65_vm2 = vcmask 236544   ;;  %vm220_vm3 = vcmask 261120  }
   0xf   :  { %v3124_v3 = vld [vmem:[%s3727_s4 + $0x18] sm:$0xff]  ;;  %2647 = vmatprep.subr.msk.mxu0 %vm90_vm1, %v57_v1  ;;  %v46_v6 = vld [vmem:[%s3723_s0] sm:$0xff]  ;;  %v3140_v7 = vld [vmem:[%s3727_s4 + $0x8] sm:$0xff]  ;;  %s3057_s15 = smov 64   ;;  %s3058_s18 = smov 32   ;;  %vm2434_vm4 = vcmask 15360  }
  0x10   :  { %2668 = vmatpush3.msra.mxu1 %v3124_v3  ;;  %2648 = vmatpush3.msk.msra.mxu0 %vm90_vm1, %v57_v1  ;;  %v54_v8 = vld [vmem:[#allocation2] sm:$0xff]  ;;  %v47_v10 = vld [vmem:[%s3723_s0 + $0x8] sm:$0xff]  ;;  %v3184_v29 = vld [vmem:[%s3727_s4 + $0x58] sm:$0xff] }
  0x11   :  { %2669 = vmatprep.subr.mxu1 %v3055_v0  ;;  %2649 = vmatprep.subr.mxu0 %v56_v2  ;;  %v3147_v9 = vld [vmem:[%s3727_s4] sm:$0xff]  ;;  %v48_v30 = vld [vmem:[%s3723_s0 + $0x10] sm:$0xff]  ;;  %v3192_v31 = vld [vmem:[%s3727_s4 + $0x78] sm:$0xff] }
  0x12   :  { %2670 = vmatpush3.msra.mxu1 %v3130_v4  ;;  %2650 = vmatpush3.msra.mxu0 %v56_v2  ;;  %v214_v11 = vld [vmem:[%s3724_s1] sm:$0xff]  ;;  %v49_v32 = vld [vmem:[%s3723_s0 + $0x18] sm:$0xff]  ;;  %v3202_v33 = vld [vmem:[%s3727_s4 + $0x70] sm:$0xff] }
  0x13   :  { %2671 = vmatprep.subr.mxu1 %v3055_v0  ;;  %2651 = vmatprep.subr.mxu0 %v55_v5  ;;  %v3169_v14 = vld [vmem:[%s3728_s5] ss:$0 sm:$0xff]  ;;  %v3207_v34 = vld [vmem:[%s3727_s4 + $0x50] sm:$0xff]  ;;  %v3219_v36 = vld [vmem:[%s3727_s4 + $0x68] sm:$0xff] }
  0x14   :  { %2655 = vmatprep.mubr.msk.f32.mxu0 %vm65_vm2, %v46_v6  ;;  %2652 = vmatpush3.msra.mxu0 %v55_v5  ;;  %v217_v20 = vld [vmem:[%s3725_s2] sm:$0xff]  ;;  %v51_v37 = vld [vmem:[%s3723_s0 + $0x28] sm:$0xff]  ;;  %v52_v40 = vld [vmem:[%s3723_s0 + $0x30] sm:$0xff] }
  0x15   :  { %2672 = vmatpush3.msra.mxu1 %v3140_v7  ;;  %2653 = vmatprep.subr.mxu0 %v54_v8  ;;  %v50_v35 = vld [vmem:[%s3723_s0 + $0x20] sm:$0xff]  ;;  %v3236_v39 = vld [vmem:[%s3727_s4 + $0x48] sm:$0xff]  ;;  %v53_v42 = vld [vmem:[%s3723_s0 + $0x38] sm:$0xff] }
  0x16   :  { %2673 = vmatprep.subr.mxu1 %v3055_v0  ;;  %2654 = vmatpush3.msra.mxu0 %v54_v8  ;;  %v3231_v38 = vld [vmem:[%s3727_s4 + $0x60] sm:$0xff]  ;;  %v2479_v41 = vld [vmem:[%s3724_s1 + $0x8] sm:$0xff] }
  0x17   :  { %2674 = vmatpush3.msra.mxu1 %v3147_v9  ;;  %2656 = vmatmul.mubr.msk.f32.vlgmr.msra.gmra.mxu0 %vm65_vm2, %v47_v10  ;;  %v3260_v44 = vld [vmem:[%s3727_s4 + $0x40] sm:$0xff]  ;;  %v2480_v6 = vld [vmem:[%s3725_s2 + $0x8] sm:$0xff] }
  0x18   :  { %2676 = vmatmul.mubr.msk.f32.vlgmr.msra.gmra.mxu1 %vm220_vm3, %v214_v11  ;;  %2689 = vmatprep.subr.mxu0 %v3055_v0  ;;  %v3318_v57 = vld [vmem:[%s3728_s5 + $0x1] ss:$0 sm:$0xff] }
  0x19   :  { %2678 = vmatprep.subr.mxu1 %v3055_v0  ;;  %2686 = vmatprep.mubr.msk.f32.mxu1 %vm3056_vm0, %v3055_v0 }
  0x1a   :  { %2690 = vmatpush3.msra.mxu0 %v3184_v29  ;;  %2658 = vmatprep.mubr.msk.f32.mxu0 %vm65_vm2, %v48_v30 }
  0x1b   :  { %2679 = vmatpush3.msra.mxu1 %v3192_v31  ;;  %2659 = vmatmul.mubr.msk.f32.gmra.mxu0 %vm65_vm2, %v49_v32 }
  0x1c   :  { %2680 = vmatprep.subr.mxu1 %v3055_v0  ;;  %2691 = vmatprep.subr.mxu0 %v3055_v0 }
  0x1d   :  { %2681 = vmatpush3.msra.mxu1 %v3202_v33  ;;  %2692 = vmatpush3.msra.mxu0 %v3207_v34 }
  0x1e   :  { %2682 = vmatprep.subr.mxu1 %v3055_v0  ;;  %2661 = vmatprep.mubr.msk.f32.mxu0 %vm65_vm2, %v50_v35 }
  0x1f   :  { %2683 = vmatpush3.msra.mxu1 %v3219_v36  ;;  %2662 = vmatmul.mubr.msk.f32.gmra.mxu0 %vm65_vm2, %v51_v37 }
  0x20   :  { %2684 = vmatprep.subr.mxu1 %v3055_v0  ;;  %2693 = vmatprep.subr.mxu0 %v3055_v0 }
  0x21   :  { %2685 = vmatpush3.msra.mxu1 %v3231_v38  ;;  %2694 = vmatpush3.msra.mxu0 %v3236_v39 }
  0x22   :  { %2700 = vmatprep.subr.mxu1 %v3055_v0  ;;  %2664 = vmatprep.mubr.msk.f32.mxu0 %vm65_vm2, %v52_v40 }
  0x23   :  { %2687 = vmatmul.mubr.msk.f32.vlgmr.msra.gmra.mxu1 %vm220_vm3, %v2479_v41  ;;  %2665 = vmatmul.mubr.msk.f32.gmra.mxu0 %vm65_vm2, %v53_v42 }
  0x24   :  { %2701 = vmatpush3.msra.mxu1 %v3124_v3  ;;  %2695 = vmatprep.subr.mxu0 %v3055_v0 }
  0x25   :  { %2702 = vmatprep.subr.mxu1 %v3055_v0  ;;  %2696 = vmatpush3.msra.mxu0 %v3260_v44 }
  0x26   :  { %2703 = vmatpush3.msra.mxu1 %v3130_v4  ;;  %2697 = vmatprep.mubr.msk.f32.mxu0 %vm3056_vm0, %v3055_v0 }
  0x27   :  { %2704 = vmatprep.subr.mxu1 %v3055_v0  ;;  %2708 = vmatprep.mubr.msk.f32.mxu1 %vm3056_vm0, %v3055_v0 }
  0x28   :  { %2705 = vmatpush3.msra.mxu1 %v3140_v7  ;;  %2711 = vmatprep.subr.mxu0 %v3055_v0 }
  0x29   :  { %2706 = vmatprep.subr.mxu1 %v3055_v0 }
  0x2a   :  { %2707 = vmatpush3.msra.mxu1 %v3147_v9 }
  0x2b   :  { %2722 = vmatprep.subr.mxu1 %v3055_v0 }
  0xd7   :  { %v3164_v12 = vpop.f32.mrf.mxu0 }
  0xd8   :  { %v290_v13 = vpop.f32.mrf.mxu1  ;;  %v166_v56 = vadd.f32 %v3164_v12, %v3169_v14 }
  0xd9   :  { %v160_v15 = vpop.f32.mrf.mxu0 }
  0xda   :  { %v2677_v16 = vpop.f32.mrf.mxu1  ;;  %v161_v17 = vadd.f32 %v3169_v14, %v160_v15 }
  0xdb   :  { %v3301_v50 = vpop.f32.mrf.mxu0 }
  0xdc   :  { %v294_v18 = vadd.f32 %v290_v13, %v161_v17 }
  0xdd   :  { %v3303_v51 = vpop.f32.mrf.mxu0 }
  0xde   :  { %2950 = vtanh.f32 %v294_v18 }
  0xdf   :  { %v3305_v52 = vpop.f32.mrf.mxu0 }
  0xe1   :  { %v3307_v53 = vpop.f32.mrf.mxu0 }
  0xe3   :  { %v388_v47 = vpop.f32.mrf.mxu1  ;;  %v3309_v54 = vpop.f32.mrf.mxu0 }
  0xe5   :  { %v2688_v48 = vpop.f32.mrf.mxu1  ;;  %v3311_v55 = vpop.f32.mrf.mxu0 }
  0xeb   :  { %v2951_v19 = vpop.eup %2950 }
  0xec   :  { %304 = vrot.lane.b32.xlu0 %v2951_v19, %s3057_s15  ;;  %v296_v21 = vadd.f32 1.0, %v2951_v19 }
  0xee   :  { %v297_v22 = vmul.f32 0.5, %v296_v21 }
  0xf0   :  { %299 = vrot.lane.b32.xlu0 %v217_v20, %s3058_s18 }
 0x15e   :  { %v305_v23 = vpop.permute.xlu0 %304 }
 0x15f   :  { %v307_v24 = vmul.f32 %v305_v23, %v297_v22 }
 0x161   :  { %309 = vrot.lane.b32.xlu1 %v307_v24, %s3058_s18 }
 0x162   :  { %v300_v25 = vpop.permute.xlu0 %299 }
 0x163   :  { %v302_v26 = vmul.f32 %v300_v25, %v297_v22 }
 0x1d3   :  { %v310_v27 = vpop.permute.xlu1 %309 }
 0x1d4   :  { %v3178_v28 = vadd.f32 %v310_v27, %v302_v26 }
 0x1d6   :  { %2952 = vtanh.f32 %v3178_v28 }
 0x1e3   :  { %v2953_v43 = vpop.eup %2952 }
 0x1e4   :  { %315 = vrot.lane.b32.xlu1 %v2953_v43, %s3057_s15 }
 0x256   :  { %v316_v45 = vpop.permute.xlu1 %315 }
 0x257   :  { %v318_v46 = vmul.f32 %v316_v45, %v297_v22 }
 0x259   :  { %393 = vrot.lane.b32.xlu0 %v318_v46, %s3058_s18 }
 0x2cb   :  { %v394_v49 = vpop.permute.xlu0 %393 }
 0x2cc   :  { %2698 = vmatmul.mubr.msk.f32.vlgmr.msra.gmra.mxu0 %vm220_vm3, %v394_v49  ;;  %2709 = vmatmul.mubr.msk.f32.vlgmr.msra.gmra.mxu1 %vm220_vm3, %v394_v49 }
 0x2cd   :  { %2723 = vmatpush3.msra.mxu1 %v3184_v29  ;;  %2712 = vmatpush3.msra.mxu0 %v3192_v31 }
 0x2ce   :  { %2724 = vmatprep.subr.mxu1 %v3055_v0  ;;  %2713 = vmatprep.subr.mxu0 %v3055_v0 }
 0x2cf   :  { %2725 = vmatpush3.msra.mxu1 %v3207_v34  ;;  %2714 = vmatpush3.msra.mxu0 %v3202_v33 }
 0x2d0   :  { %2726 = vmatprep.subr.mxu1 %v3055_v0  ;;  %2715 = vmatprep.subr.mxu0 %v3055_v0 }
 0x2d1   :  { %2727 = vmatpush3.msra.mxu1 %v3236_v39  ;;  %2716 = vmatpush3.msra.mxu0 %v3219_v36 }
 0x2d2   :  { %2728 = vmatprep.subr.mxu1 %v3055_v0  ;;  %2717 = vmatprep.subr.mxu0 %v3055_v0 }
 0x2d3   :  { %2729 = vmatpush3.msra.mxu1 %v3260_v44  ;;  %2730 = vmatprep.mubr.msk.f32.mxu1 %vm3056_vm0, %v3055_v0 }
 0x2d4   :  { %2718 = vmatpush3.msra.mxu0 %v3231_v38  ;;  %2719 = vmatprep.mubr.msk.f32.mxu0 %vm3056_vm0, %v3055_v0 }
 0x2d5   :  { %2733 = vmatprep.subr.mxu0 %v3055_v0  ;;  %2744 = vmatprep.subr.mxu1 %v3055_v0 }
 0x38c   :  { %v463_v58 = vpop.f32.mrf.mxu0  ;;  %v564_v59 = vpop.f32.mrf.mxu1 }
 0x38d   :  { %v464_v60 = vadd.f32 %v463_v58, %v388_v47  ;;  %v568_v61 = vadd.f32 %v564_v59, %v166_v56  ;;  %v171_v47 = vadd.f32 %v3169_v14, %v3303_v51 }
 0x38e   :  { %v2699_v62 = vpop.f32.mrf.mxu0  ;;  %v2710_v63 = vpop.f32.mrf.mxu1 }
 0x38f   :  { %v473_v1 = vadd.f32 %v3318_v57, %v464_v60  ;;  %2954 = vtanh.f32 %v568_v61 }
 0x391   :  { %2956 = vtanh.f32 %v473_v1 }
 0x39c   :  { %v2955_v2 = vpop.eup %2954 }
 0x39d   :  { %574 = vrot.lane.b32.xlu0 %v2955_v2, %s3057_s15  ;;  %v570_v8 = vadd.f32 1.0, %v2955_v2 }
 0x39e   :  { %v2957_v5 = vpop.eup %2956 }
 0x39f   :  { %483 = vrot.lane.b32.xlu1 %v2957_v5, %s3057_s15  ;;  %v475_v10 = vadd.f32 1.0, %v2957_v5  ;;  %v571_v11 = vmul.f32 0.5, %v570_v8 }
 0x3a1   :  { %v476_v15 = vmul.f32 0.5, %v475_v10  ;;  %v572_v19 = vmul.f32 %v571_v11, %v3178_v28 }
 0x3a3   :  { %478 = vrot.lane.b32.xlu1 %v2480_v6, %s3058_s18 }
 0x40f   :  { %v575_v12 = vpop.permute.xlu0 %574 }
 0x410   :  { %v577_v13 = vmul.f32 %v575_v12, %v571_v11 }
 0x411   :  { %v484_v16 = vpop.permute.xlu1 %483 }
 0x412   :  { %v486_v17 = vmul.f32 %v484_v16, %v476_v15  ;;  %579 = vrot.lane.b32.xlu1 %v577_v13, %s3058_s18 }
 0x414   :  { %488 = vrot.lane.b32.xlu0 %v486_v17, %s3058_s18 }
 0x415   :  { %v479_v18 = vpop.permute.xlu1 %478 }
 0x416   :  { %v481_v21 = vmul.f32 %v479_v18, %v476_v15 }
 0x484   :  { %v580_v20 = vpop.permute.xlu1 %579 }
 0x485   :  { %v3330_v22 = vadd.f32 %v580_v20, %v572_v19 }
 0x486   :  { %v489_v23 = vpop.permute.xlu0 %488 }
 0x487   :  { %2958 = vtanh.f32 %v3330_v22  ;;  %v3333_v24 = vadd.f32 %v489_v23, %v481_v21 }
 0x489   :  { %2960 = vtanh.f32 %v3333_v24 }
 0x494   :  { %v2959_v25 = vpop.eup %2958 }
 0x495   :  { %585 = vrot.lane.b32.xlu1 %v2959_v25, %s3057_s15 }
 0x496   :  { %v2961_v26 = vpop.eup %2960 }
 0x497   :  { %494 = vrot.lane.b32.xlu0 %v2961_v26, %s3057_s15  ;;  %v176_v26 = vadd.f32 %v3301_v50, %v3169_v14 }
 0x507   :  { %v586_v27 = vpop.permute.xlu1 %585 }
 0x508   :  { %v588_v30 = vmul.f32 %v586_v27, %v571_v11 }
 0x509   :  { %v495_v28 = vpop.permute.xlu0 %494 }
 0x50a   :  { %v497_v32 = vmul.f32 %v495_v28, %v476_v15  ;;  %665 = vrot.lane.b32.xlu1 %v588_v30, %s3058_s18 }
 0x50c   :  { %590 = vrot.lane.b32.xlu0 %v497_v32, %s3058_s18 }
 0x57c   :  { %v666_v35 = vpop.permute.xlu1 %665 }
 0x57d   :  { %2731 = vmatmul.mubr.msk.f32.vlgmr.msra.gmra.mxu1 %vm220_vm3, %v666_v35 }
 0x57e   :  { %v591_v37 = vpop.permute.xlu0 %590  ;;  %2745 = vmatpush3.msra.mxu1 %v3192_v31  ;;  %2752 = vmatprep.mubr.msk.f32.mxu1 %vm3056_vm0, %v3055_v0 }
 0x57f   :  { %2720 = vmatmul.mubr.msk.f32.vlgmr.msra.gmra.mxu0 %vm220_vm3, %v591_v37  ;;  %2746 = vmatprep.subr.mxu1 %v3055_v0 }
 0x580   :  { %2734 = vmatpush3.msra.mxu0 %v3124_v3  ;;  %2741 = vmatprep.mubr.msk.f32.mxu0 %vm3056_vm0, %v3055_v0 }
 0x581   :  { %2735 = vmatprep.subr.mxu0 %v3055_v0  ;;  %2747 = vmatpush3.msra.mxu1 %v3202_v33 }
 0x582   :  { %2736 = vmatpush3.msra.mxu0 %v3130_v4  ;;  %2748 = vmatprep.subr.mxu1 %v3055_v0 }
 0x583   :  { %2737 = vmatprep.subr.mxu0 %v3055_v0  ;;  %2749 = vmatpush3.msra.mxu1 %v3219_v36 }
 0x584   :  { %2738 = vmatpush3.msra.mxu0 %v3140_v7  ;;  %2750 = vmatprep.subr.mxu1 %v3055_v0 }
 0x585   :  { %2739 = vmatprep.subr.mxu0 %v3055_v0  ;;  %2751 = vmatpush3.msra.mxu1 %v3231_v38 }
 0x586   :  { %2740 = vmatpush3.msra.mxu0 %v3147_v9  ;;  %2766 = vmatprep.subr.mxu1 %v3055_v0 }
 0x587   :  { %2742 = vmatmul.mubr.msk.f32.vlgmr.msra.gmra.mxu0 %vm220_vm3, %v666_v35  ;;  %2755 = vmatprep.subr.mxu0 %v3055_v0 }
 0x588   :  { %2756 = vmatpush3.msra.mxu0 %v3184_v29  ;;  %2763 = vmatprep.mubr.msk.f32.mxu0 %vm3056_vm0, %v3055_v0 }
 0x589   :  { %2757 = vmatprep.subr.mxu0 %v3055_v0 }
 0x58a   :  { %2758 = vmatpush3.msra.mxu0 %v3207_v34 }
 0x58b   :  { %2759 = vmatprep.subr.mxu0 %v3055_v0 }
 0x58c   :  { %2760 = vmatpush3.msra.mxu0 %v3236_v39 }
 0x58d   :  { %2761 = vmatprep.subr.mxu0 %v3055_v0 }
 0x58e   :  { %2762 = vmatpush3.msra.mxu0 %v3260_v44 }
 0x58f   :  { %2777 = vmatprep.subr.mxu0 %v3055_v0 }
 0x63d   :  { %v735_v40 = vpop.f32.mrf.mxu1 }
 0x63f   :  { %v660_v41 = vpop.f32.mrf.mxu0  ;;  %v2732_v42 = vpop.f32.mrf.mxu1 }
 0x640   :  { %v736_v43 = vadd.f32 %v735_v40, %v660_v41 }
 0x641   :  { %v2721_v45 = vpop.f32.mrf.mxu0 }
 0x642   :  { %v739_v46 = vadd.f32 %v3318_v57, %v736_v43 }
 0x644   :  { %2962 = vtanh.f32 %v739_v46 }
 0x647   :  { %v826_v48 = vpop.f32.mrf.mxu0 }
 0x648   :  { %v830_v49 = vadd.f32 %v826_v48, %v171_v47 }
 0x649   :  { %v2743_v56 = vpop.f32.mrf.mxu0 }
 0x64a   :  { %2964 = vtanh.f32 %v830_v49 }
 0x651   :  { %v2963_v58 = vpop.eup %2962 }
 0x652   :  { %745 = vrot.lane.b32.xlu0 %v2963_v58, %s3057_s15  ;;  %v741_v60 = vadd.f32 1.0, %v2963_v58 }
 0x654   :  { %v742_v61 = vmul.f32 0.5, %v741_v60 }
 0x656   :  { %v743_v6 = vmul.f32 %v742_v61, %v3333_v24 }
 0x657   :  { %v2965_v59 = vpop.eup %2964 }
 0x658   :  { %836 = vrot.lane.b32.xlu1 %v2965_v59, %s3057_s15  ;;  %v832_v1 = vadd.f32 1.0, %v2965_v59 }
 0x65a   :  { %v833_v2 = vmul.f32 0.5, %v832_v1 }
 0x65c   :  { %v834_v11 = vmul.f32 %v833_v2, %v3330_v22 }
 0x6c4   :  { %v746_v62 = vpop.permute.xlu0 %745 }
 0x6c5   :  { %v748_v63 = vmul.f32 %v746_v62, %v742_v61 }
 0x6c7   :  { %750 = vrot.lane.b32.xlu0 %v748_v63, %s3058_s18 }
 0x6ca   :  { %v837_v5 = vpop.permute.xlu1 %836 }
 0x6cb   :  { %v839_v51 = vmul.f32 %v837_v5, %v833_v2 }
 0x6cd   :  { %841 = vrot.lane.b32.xlu1 %v839_v51, %s3058_s18 }
 0x739   :  { %v751_v8 = vpop.permute.xlu0 %750 }
 0x73a   :  { %v3381_v10 = vadd.f32 %v751_v8, %v743_v6 }
 0x73c   :  { %2966 = vtanh.f32 %v3381_v10 }
 0x73f   :  { %v842_v12 = vpop.permute.xlu1 %841 }
 0x740   :  { %v3385_v13 = vadd.f32 %v842_v12, %v834_v11 }
 0x742   :  { %2968 = vtanh.f32 %v3385_v13 }
 0x749   :  { %v2967_v15 = vpop.eup %2966 }
 0x74a   :  { %756 = vrot.lane.b32.xlu0 %v2967_v15, %s3057_s15 }
 0x74f   :  { %v2969_v16 = vpop.eup %2968 }
 0x750   :  { %847 = vrot.lane.b32.xlu1 %v2969_v16, %s3057_s15 }
 0x7bc   :  { %v757_v17 = vpop.permute.xlu0 %756 }
 0x7bd   :  { %v759_v18 = vmul.f32 %v757_v17, %v742_v61 }
 0x7bf   :  { %852 = vrot.lane.b32.xlu0 %v759_v18, %s3058_s18  ;;  %v181_v18 = vadd.f32 %v3169_v14, %v3307_v53 }
 0x7c2   :  { %v848_v19 = vpop.permute.xlu1 %847 }
 0x7c3   :  { %v850_v20 = vmul.f32 %v848_v19, %v833_v2 }
 0x7c5   :  { %927 = vrot.lane.b32.xlu1 %v850_v20, %s3058_s18 }
 0x831   :  { %v853_v21 = vpop.permute.xlu0 %852 }
 0x832   :  { %2753 = vmatmul.mubr.msk.f32.vlgmr.msra.gmra.mxu1 %vm220_vm3, %v853_v21 }
 0x833   :  { %2767 = vmatpush3.msra.mxu1 %v3124_v3  ;;  %2774 = vmatprep.mubr.msk.f32.mxu1 %vm3056_vm0, %v3055_v0 }
 0x834   :  { %2768 = vmatprep.subr.mxu1 %v3055_v0 }
 0x835   :  { %2769 = vmatpush3.msra.mxu1 %v3130_v4 }
 0x836   :  { %2770 = vmatprep.subr.mxu1 %v3055_v0 }
 0x837   :  { %2771 = vmatpush3.msra.mxu1 %v3140_v7  ;;  %v928_v22 = vpop.permute.xlu1 %927 }
 0x838   :  { %2764 = vmatmul.mubr.msk.f32.vlgmr.msra.gmra.mxu0 %vm220_vm3, %v928_v22  ;;  %2772 = vmatprep.subr.mxu1 %v3055_v0 }
 0x839   :  { %2773 = vmatpush3.msra.mxu1 %v3147_v9  ;;  %2778 = vmatpush3.msra.mxu0 %v3192_v31 }
 0x83a   :  { %2775 = vmatmul.mubr.msk.f32.vlgmr.msra.gmra.mxu1 %vm220_vm3, %v928_v22  ;;  %2788 = vmatprep.subr.mxu1 %v3055_v0 }
 0x83b   :  { %2779 = vmatprep.subr.mxu0 %v3055_v0  ;;  %2789 = vmatpush3.msra.mxu1 %v3184_v29 }
 0x83c   :  { %2780 = vmatpush3.msra.mxu0 %v3202_v33  ;;  %2790 = vmatprep.subr.mxu1 %v3055_v0 }
 0x83d   :  { %2781 = vmatprep.subr.mxu0 %v3055_v0  ;;  %2791 = vmatpush3.msra.mxu1 %v3207_v34 }
 0x83e   :  { %2782 = vmatpush3.msra.mxu0 %v3219_v36  ;;  %2792 = vmatprep.subr.mxu1 %v3055_v0 }
 0x83f   :  { %2783 = vmatprep.subr.mxu0 %v3055_v0  ;;  %2793 = vmatpush3.msra.mxu1 %v3236_v39 }
 0x840   :  { %2784 = vmatpush3.msra.mxu0 %v3231_v38  ;;  %2794 = vmatprep.subr.mxu1 %v3055_v0 }
 0x841   :  { %2795 = vmatpush3.msra.mxu1 %v3260_v44  ;;  %2796 = vmatprep.mubr.msk.f32.mxu1 %vm3056_vm0, %v3055_v0 }
 0x842   :  { %2785 = vmatprep.mubr.msk.f32.mxu0 %vm3056_vm0, %v3055_v0  ;;  %2799 = vmatprep.subr.mxu0 %v3055_v0 }
 0x843   :  { %2810 = vmatprep.subr.mxu1 %v3055_v0 }
 0x8f2   :  { %v922_v23 = vpop.f32.mrf.mxu1 }
 0x8f4   :  { %v2754_v24 = vpop.f32.mrf.mxu1 }
 0x8f8   :  { %v997_v25 = vpop.f32.mrf.mxu0 }
 0x8f9   :  { %v998_v27 = vadd.f32 %v997_v25, %v922_v23 }
 0x8fa   :  { %v2765_v30 = vpop.f32.mrf.mxu0  ;;  %v1088_v28 = vpop.f32.mrf.mxu1 }
 0x8fb   :  { %v1001_v32 = vadd.f32 %v3318_v57, %v998_v27  ;;  %v1092_v35 = vadd.f32 %v1088_v28, %v176_v26 }
 0x8fc   :  { %v2776_v37 = vpop.f32.mrf.mxu1 }
 0x8fd   :  { %2970 = vtanh.f32 %v1001_v32 }
 0x8fe   :  { %2972 = vtanh.f32 %v1092_v35 }
 0x90a   :  { %v2971_v40 = vpop.eup %2970 }
 0x90b   :  { %v2973_v41 = vpop.eup %2972  ;;  %1007 = vrot.lane.b32.xlu0 %v2971_v40, %s3057_s15  ;;  %v1003_v42 = vadd.f32 1.0, %v2971_v40 }
 0x90c   :  { %1098 = vrot.lane.b32.xlu1 %v2973_v41, %s3057_s15  ;;  %v1094_v43 = vadd.f32 1.0, %v2973_v41 }
 0x90d   :  { %v1004_v45 = vmul.f32 0.5, %v1003_v42 }
 0x90e   :  { %v1095_v46 = vmul.f32 0.5, %v1094_v43 }
 0x90f   :  { %v1005_v56 = vmul.f32 %v1004_v45, %v3381_v10 }
 0x910   :  { %v1096_v58 = vmul.f32 %v1095_v46, %v3385_v13 }
 0x97d   :  { %v1008_v50 = vpop.permute.xlu0 %1007 }
 0x97e   :  { %v1099_v47 = vpop.permute.xlu1 %1098  ;;  %v1010_v48 = vmul.f32 %v1008_v50, %v1004_v45 }
 0x97f   :  { %v1101_v49 = vmul.f32 %v1099_v47, %v1095_v46 }
 0x980   :  { %1012 = vrot.lane.b32.xlu0 %v1010_v48, %s3058_s18 }
 0x981   :  { %1103 = vrot.lane.b32.xlu1 %v1101_v49, %s3058_s18 }
 0x9f2   :  { %v1013_v59 = vpop.permute.xlu0 %1012 }
 0x9f3   :  { %v1104_v60 = vpop.permute.xlu1 %1103  ;;  %v3434_v61 = vadd.f32 %v1013_v59, %v1005_v56 }
 0x9f4   :  { %v3436_v62 = vadd.f32 %v1104_v60, %v1096_v58 }
 0x9f5   :  { %2974 = vtanh.f32 %v3434_v61 }
 0x9f6   :  { %2976 = vtanh.f32 %v3436_v62 }
 0xa02   :  { %v2975_v63 = vpop.eup %2974 }
 0xa03   :  { %v2977_v1 = vpop.eup %2976  ;;  %1018 = vrot.lane.b32.xlu0 %v2975_v63, %s3057_s15  ;;  %v186_v63 = vadd.f32 %v3305_v52, %v3169_v14 }
 0xa04   :  { %1109 = vrot.lane.b32.xlu1 %v2977_v1, %s3057_s15 }
 0xa75   :  { %v1019_v2 = vpop.permute.xlu0 %1018 }
 0xa76   :  { %v1110_v5 = vpop.permute.xlu1 %1109  ;;  %v1021_v51 = vmul.f32 %v1019_v2, %v1004_v45 }
 0xa77   :  { %v1112_v6 = vmul.f32 %v1110_v5, %v1095_v46 }
 0xa78   :  { %1114 = vrot.lane.b32.xlu0 %v1021_v51, %s3058_s18 }
 0xa79   :  { %1189 = vrot.lane.b32.xlu1 %v1112_v6, %s3058_s18 }
 0xaea   :  { %v1115_v8 = vpop.permute.xlu0 %1114 }
 0xaeb   :  { %v1190_v10 = vpop.permute.xlu1 %1189  ;;  %2786 = vmatmul.mubr.msk.f32.vlgmr.msra.gmra.mxu0 %vm220_vm3, %v1115_v8 }
 0xaec   :  { %2797 = vmatmul.mubr.msk.f32.vlgmr.msra.gmra.mxu1 %vm220_vm3, %v1190_v10  ;;  %2800 = vmatpush3.msra.mxu0 %v3124_v3 }
 0xaed   :  { %2801 = vmatprep.subr.mxu0 %v3055_v0  ;;  %2807 = vmatprep.mubr.msk.f32.mxu0 %vm3056_vm0, %v3055_v0 }
 0xaee   :  { %2802 = vmatpush3.msra.mxu0 %v3130_v4  ;;  %2811 = vmatpush3.msra.mxu1 %v3192_v31 }
 0xaef   :  { %2803 = vmatprep.subr.mxu0 %v3055_v0  ;;  %2812 = vmatprep.subr.mxu1 %v3055_v0 }
 0xaf0   :  { %2804 = vmatpush3.msra.mxu0 %v3140_v7  ;;  %2813 = vmatpush3.msra.mxu1 %v3202_v33 }
 0xaf1   :  { %2805 = vmatprep.subr.mxu0 %v3055_v0  ;;  %2814 = vmatprep.subr.mxu1 %v3055_v0 }
 0xaf2   :  { %2806 = vmatpush3.msra.mxu0 %v3147_v9  ;;  %2815 = vmatpush3.msra.mxu1 %v3219_v36 }
 0xaf3   :  { %2808 = vmatmul.mubr.msk.f32.vlgmr.msra.gmra.mxu0 %vm220_vm3, %v1190_v10  ;;  %2816 = vmatprep.subr.mxu1 %v3055_v0 }
 0xaf4   :  { %2821 = vmatprep.subr.mxu0 %v3055_v0  ;;  %2817 = vmatpush3.msra.mxu1 %v3231_v38 }
 0xaf5   :  { %2822 = vmatpush3.msra.mxu0 %v3184_v29  ;;  %2818 = vmatprep.mubr.msk.f32.mxu1 %vm3056_vm0, %v3055_v0 }
 0xaf6   :  { %2823 = vmatprep.subr.mxu0 %v3055_v0  ;;  %2832 = vmatprep.subr.mxu1 %v3055_v0 }
 0xaf7   :  { %2824 = vmatpush3.msra.mxu0 %v3207_v34  ;;  %2829 = vmatprep.mubr.msk.f32.mxu0 %vm3056_vm0, %v3055_v0 }
 0xaf8   :  { %2825 = vmatprep.subr.mxu0 %v3055_v0 }
 0xaf9   :  { %2826 = vmatpush3.msra.mxu0 %v3236_v39 }
 0xafa   :  { %2827 = vmatprep.subr.mxu0 %v3055_v0 }
 0xafb   :  { %2828 = vmatpush3.msra.mxu0 %v3260_v44 }
 0xafc   :  { %2843 = vmatprep.subr.mxu0 %v3055_v0 }
 0xbab   :  { %v1184_v11 = vpop.f32.mrf.mxu0 }
 0xbac   :  { %v1259_v12 = vpop.f32.mrf.mxu1 }
 0xbad   :  { %v1260_v13 = vadd.f32 %v1259_v12, %v1184_v11  ;;  %v2787_v15 = vpop.f32.mrf.mxu0 }
 0xbae   :  { %v2798_v16 = vpop.f32.mrf.mxu1 }
 0xbaf   :  { %v1263_v17 = vadd.f32 %v3318_v57, %v1260_v13 }
 0xbb1   :  { %2978 = vtanh.f32 %v1263_v17 }
 0xbb3   :  { %v1350_v19 = vpop.f32.mrf.mxu0 }
 0xbb4   :  { %v1354_v20 = vadd.f32 %v1350_v19, %v181_v18 }
 0xbb5   :  { %v2809_v21 = vpop.f32.mrf.mxu0 }
 0xbb6   :  { %2980 = vtanh.f32 %v1354_v20 }
 0xbbe   :  { %v2979_v22 = vpop.eup %2978 }
 0xbbf   :  { %1269 = vrot.lane.b32.xlu0 %v2979_v22, %s3057_s15  ;;  %v1265_v24 = vadd.f32 1.0, %v2979_v22 }
 0xbc1   :  { %v1266_v25 = vmul.f32 0.5, %v1265_v24 }
 0xbc3   :  { %v2981_v23 = vpop.eup %2980  ;;  %v1267_v35 = vmul.f32 %v1266_v25, %v3434_v61 }
 0xbc4   :  { %1360 = vrot.lane.b32.xlu1 %v2981_v23, %s3057_s15  ;;  %v1356_v27 = vadd.f32 1.0, %v2981_v23 }
 0xbc6   :  { %v1357_v28 = vmul.f32 0.5, %v1356_v27 }
 0xbc8   :  { %v1358_v41 = vmul.f32 %v1357_v28, %v3436_v62 }
 0xc31   :  { %v1270_v26 = vpop.permute.xlu0 %1269 }
 0xc32   :  { %v1272_v30 = vmul.f32 %v1270_v26, %v1266_v25 }
 0xc34   :  { %1274 = vrot.lane.b32.xlu0 %v1272_v30, %s3058_s18 }
 0xc36   :  { %v1361_v32 = vpop.permute.xlu1 %1360 }
 0xc37   :  { %v1363_v53 = vmul.f32 %v1361_v32, %v1357_v28 }
 0xc39   :  { %1365 = vrot.lane.b32.xlu1 %v1363_v53, %s3058_s18 }
 0xca6   :  { %v1275_v37 = vpop.permute.xlu0 %1274 }
 0xca7   :  { %v3485_v40 = vadd.f32 %v1275_v37, %v1267_v35 }
 0xca9   :  { %2982 = vtanh.f32 %v3485_v40 }
 0xcab   :  { %v1366_v42 = vpop.permute.xlu1 %1365 }
 0xcac   :  { %v3489_v43 = vadd.f32 %v1366_v42, %v1358_v41 }
 0xcae   :  { %2984 = vtanh.f32 %v3489_v43 }
 0xcb6   :  { %v2983_v45 = vpop.eup %2982 }
 0xcb7   :  { %1280 = vrot.lane.b32.xlu0 %v2983_v45, %s3057_s15 }
 0xcbb   :  { %v2985_v46 = vpop.eup %2984 }
 0xcbc   :  { %1371 = vrot.lane.b32.xlu1 %v2985_v46, %s3057_s15 }
 0xd29   :  { %v1281_v50 = vpop.permute.xlu0 %1280 }
 0xd2a   :  { %v1283_v47 = vmul.f32 %v1281_v50, %v1266_v25 }
 0xd2c   :  { %1376 = vrot.lane.b32.xlu0 %v1283_v47, %s3058_s18 }
 0xd2e   :  { %v1372_v48 = vpop.permute.xlu1 %1371 }
 0xd2f   :  { %v1374_v49 = vmul.f32 %v1372_v48, %v1357_v28 }
 0xd31   :  { %1451 = vrot.lane.b32.xlu1 %v1374_v49, %s3058_s18 }
 0xd9e   :  { %v1377_v56 = vpop.permute.xlu0 %1376 }
 0xd9f   :  { %2819 = vmatmul.mubr.msk.f32.vlgmr.msra.gmra.mxu1 %vm220_vm3, %v1377_v56 }
 0xda0   :  { %2833 = vmatpush3.msra.mxu1 %v3124_v3  ;;  %2840 = vmatprep.mubr.msk.f32.mxu1 %vm3056_vm0, %v3055_v0 }
 0xda1   :  { %2834 = vmatprep.subr.mxu1 %v3055_v0 }
 0xda2   :  { %2835 = vmatpush3.msra.mxu1 %v3130_v4 }
 0xda3   :  { %2836 = vmatprep.subr.mxu1 %v3055_v0  ;;  %v1452_v58 = vpop.permute.xlu1 %1451 }
 0xda4   :  { %2837 = vmatpush3.msra.mxu1 %v3140_v7  ;;  %2830 = vmatmul.mubr.msk.f32.vlgmr.msra.gmra.mxu0 %vm220_vm3, %v1452_v58 }
 0xda5   :  { %2838 = vmatprep.subr.mxu1 %v3055_v0  ;;  %2844 = vmatpush3.msra.mxu0 %v3192_v31 }
 0xda6   :  { %2839 = vmatpush3.msra.mxu1 %v3147_v9  ;;  %2845 = vmatprep.subr.mxu0 %v3055_v0 }
 0xda7   :  { %2841 = vmatmul.mubr.msk.f32.vlgmr.msra.gmra.mxu1 %vm220_vm3, %v1452_v58  ;;  %2854 = vmatprep.subr.mxu1 %v3055_v0 }
 0xda8   :  { %2855 = vmatpush3.msra.mxu1 %v3184_v29  ;;  %2846 = vmatpush3.msra.mxu0 %v3202_v33 }
 0xda9   :  { %2856 = vmatprep.subr.mxu1 %v3055_v0  ;;  %2847 = vmatprep.subr.mxu0 %v3055_v0 }
 0xdaa   :  { %2857 = vmatpush3.msra.mxu1 %v3207_v34  ;;  %2848 = vmatpush3.msra.mxu0 %v3219_v36 }
 0xdab   :  { %2858 = vmatprep.subr.mxu1 %v3055_v0  ;;  %2849 = vmatprep.subr.mxu0 %v3055_v0 }
 0xdac   :  { %2859 = vmatpush3.msra.mxu1 %v3236_v39  ;;  %2850 = vmatpush3.msra.mxu0 %v3231_v38 }
 0xdad   :  { %2860 = vmatprep.subr.mxu1 %v3055_v0  ;;  %2862 = vmatprep.mubr.msk.f32.mxu1 %vm3056_vm0, %v3055_v0 }
 0xdae   :  { %2861 = vmatpush3.msra.mxu1 %v3260_v44  ;;  %2851 = vmatprep.mubr.msk.f32.mxu0 %vm3056_vm0, %v3055_v0 }
 0xdaf   :  { %2865 = vmatprep.subr.mxu0 %v3055_v0  ;;  %2876 = vmatprep.subr.mxu1 %v3055_v0 }
 0xe5f   :  { %v1446_v59 = vpop.f32.mrf.mxu1 }
 0xe61   :  { %v2820_v60 = vpop.f32.mrf.mxu1 }
 0xe64   :  { %v1521_v61 = vpop.f32.mrf.mxu0 }
 0xe65   :  { %v1522_v62 = vadd.f32 %v1521_v61, %v1446_v59 }
 0xe66   :  { %v2831_v1 = vpop.f32.mrf.mxu0 }
 0xe67   :  { %v1525_v2 = vadd.f32 %v3318_v57, %v1522_v62  ;;  %v1612_v5 = vpop.f32.mrf.mxu1 }
 0xe68   :  { %v1616_v51 = vadd.f32 %v1612_v5, %v186_v63  ;;  %v3018_v5 = vld [vmem:[%s3727_s4 + $0x18] sm:$0xff] }
 0xe69   :  { %2986 = vtanh.f32 %v1525_v2  ;;  %v2842_v6 = vpop.f32.mrf.mxu1 }
 0xe6a   :  { %2988 = vtanh.f32 %v1616_v51  ;;  %v3019_v51 = vld [vmem:[%s3727_s4 + $0x10] sm:$0xff] }
 0xe76   :  { %v2987_v8 = vpop.eup %2986 }
 0xe77   :  { %v2989_v10 = vpop.eup %2988  ;;  %1531 = vrot.lane.b32.xlu0 %v2987_v8, %s3057_s15  ;;  %v1527_v11 = vadd.f32 1.0, %v2987_v8  ;;  %v3020_v8 = vld [vmem:[%s3727_s4 + $0x8] sm:$0xff] }
 0xe78   :  { %1622 = vrot.lane.b32.xlu1 %v2989_v10, %s3057_s15  ;;  %v1618_v12 = vadd.f32 1.0, %v2989_v10  ;;  %v3021_v10 = vld [vmem:[%s3727_s4 + $0x78] sm:$0xff] }
 0xe79   :  { %v1528_v13 = vmul.f32 0.5, %v1527_v11  ;;  %v3022_v11 = vld [vmem:[%s3727_s4] sm:$0xff] }
 0xe7a   :  { %v1619_v15 = vmul.f32 0.5, %v1618_v12  ;;  %v3023_v12 = vld [vmem:[%s3727_s4 + $0x58] sm:$0xff] }
 0xe7b   :  { %v1529_v19 = vmul.f32 %v1528_v13, %v3485_v40 }
 0xe7c   :  { %v1620_v20 = vmul.f32 %v1619_v15, %v3489_v43 }
 0xee9   :  { %v1532_v16 = vpop.permute.xlu0 %1531 }
 0xeea   :  { %v1623_v52 = vpop.permute.xlu1 %1622  ;;  %v1534_v17 = vmul.f32 %v1532_v16, %v1528_v13  ;;  %v3026_v16 = vld [vmem:[%s3727_s4 + $0x68] sm:$0xff] }
 0xeeb   :  { %v1625_v18 = vmul.f32 %v1623_v52, %v1619_v15  ;;  %v3027_v52 = vld [vmem:[%s3727_s4 + $0x48] sm:$0xff] }
 0xeec   :  { %1536 = vrot.lane.b32.xlu0 %v1534_v17, %s3058_s18  ;;  %v3028_v17 = vld [vmem:[%s3727_s4 + $0x60] sm:$0xff] }
 0xeed   :  { %1627 = vrot.lane.b32.xlu1 %v1625_v18, %s3058_s18 }
 0xf5e   :  { %v1537_v21 = vpop.permute.xlu0 %1536 }
 0xf5f   :  { %v1628_v22 = vpop.permute.xlu1 %1627  ;;  %v3538_v23 = vadd.f32 %v1537_v21, %v1529_v19 }
 0xf60   :  { %v3540_v24 = vadd.f32 %v1628_v22, %v1620_v20  ;;  %v3029_v22 = vld [vmem:[%s3728_s5] ss:$0 sm:$0xff] }
 0xf61   :  { %2990 = vtanh.f32 %v3538_v23 }
 0xf62   :  { %2992 = vtanh.f32 %v3540_v24 }
 0xf6e   :  { %v2991_v25 = vpop.eup %2990 }
 0xf6f   :  { %v2993_v26 = vpop.eup %2992  ;;  %1542 = vrot.lane.b32.xlu0 %v2991_v25, %s3057_s15 }
 0xf70   :  { %1633 = vrot.lane.b32.xlu1 %v2993_v26, %s3057_s15 }
 0xfe1   :  { %v1543_v27 = vpop.permute.xlu0 %1542 }
 0xfe2   :  { %v1634_v30 = vpop.permute.xlu1 %1633  ;;  %v1545_v28 = vmul.f32 %v1543_v27, %v1528_v13  ;;  %v3024_v13 = vld [vmem:[%s3727_s4 + $0x70] sm:$0xff] }
 0xfe3   :  { %v1636_v32 = vmul.f32 %v1634_v30, %v1619_v15  ;;  %v3025_v15 = vld [vmem:[%s3727_s4 + $0x50] sm:$0xff] }
 0xfe4   :  { %1638 = vrot.lane.b32.xlu0 %v1545_v28, %s3058_s18 }
 0xfe5   :  { %1713 = vrot.lane.b32.xlu1 %v1636_v32, %s3058_s18 }
0x1056   :  { %v1639_v53 = vpop.permute.xlu0 %1638 }
0x1057   :  { %v1714_v35 = vpop.permute.xlu1 %1713  ;;  %2852 = vmatmul.mubr.msk.f32.vlgmr.msra.gmra.mxu0 %vm220_vm3, %v1639_v53 }
0x1058   :  { %2863 = vmatmul.mubr.msk.f32.vlgmr.msra.gmra.mxu1 %vm220_vm3, %v1714_v35  ;;  %2866 = vmatpush3.msra.mxu0 %v3124_v3 }
0x1059   :  { %2867 = vmatprep.subr.mxu0 %v3055_v0  ;;  %2873 = vmatprep.mubr.msk.f32.mxu0 %vm3056_vm0, %v3055_v0 }
0x105a   :  { %2868 = vmatpush3.msra.mxu0 %v3130_v4  ;;  %2877 = vmatpush3.msra.mxu1 %v3192_v31 }
0x105b   :  { %2869 = vmatprep.subr.mxu0 %v3055_v0  ;;  %2878 = vmatprep.subr.mxu1 %v3055_v0 }
0x105c   :  { %2870 = vmatpush3.msra.mxu0 %v3140_v7  ;;  %2879 = vmatpush3.msra.mxu1 %v3202_v33  ;;  %v191_v33 = vadd.f32 %v3169_v14, %v3311_v55 }
0x105d   :  { %2871 = vmatprep.subr.mxu0 %v3055_v0  ;;  %2880 = vmatprep.subr.mxu1 %v3055_v0 }
0x105e   :  { %2872 = vmatpush3.msra.mxu0 %v3147_v9  ;;  %2881 = vmatpush3.msra.mxu1 %v3219_v36 }
0x105f   :  { %2874 = vmatmul.mubr.msk.f32.vlgmr.msra.gmra.mxu0 %vm220_vm3, %v1714_v35  ;;  %2882 = vmatprep.subr.mxu1 %v3055_v0 }
0x1060   :  { %2887 = vmatprep.subr.mxu0 %v3055_v0  ;;  %2883 = vmatpush3.msra.mxu1 %v3231_v38 }
0x1061   :  { %2888 = vmatpush3.msra.mxu0 %v3184_v29  ;;  %2884 = vmatprep.mubr.msk.f32.mxu1 %vm3056_vm0, %v3055_v0 }
0x1062   :  { %2889 = vmatprep.subr.mxu0 %v3055_v0  ;;  %2898 = vmatprep.subr.mxu1 %v3055_v0 }
0x1063   :  { %2890 = vmatpush3.msra.mxu0 %v3207_v34  ;;  %2895 = vmatprep.mubr.msk.f32.mxu0 %vm3056_vm0, %v3055_v0 }
0x1064   :  { %2891 = vmatprep.subr.mxu0 %v3055_v0 }
0x1065   :  { %2892 = vmatpush3.msra.mxu0 %v3236_v39 }
0x1066   :  { %2893 = vmatprep.subr.mxu0 %v3055_v0 }
0x1067   :  { %2894 = vmatpush3.msra.mxu0 %v3260_v44 }
0x1068   :  { %2909 = vmatprep.subr.mxu0 %v3055_v0 }
0x1117   :  { %v1708_v3 = vpop.f32.mrf.mxu0 }
0x1118   :  { %v1783_v4 = vpop.f32.mrf.mxu1 }
0x1119   :  { %v1784_v7 = vadd.f32 %v1783_v4, %v1708_v3  ;;  %v2853_v9 = vpop.f32.mrf.mxu0 }
0x111a   :  { %v2864_v29 = vpop.f32.mrf.mxu1 }
0x111b   :  { %v1787_v31 = vadd.f32 %v3318_v57, %v1784_v7 }
0x111d   :  { %2994 = vtanh.f32 %v1787_v31 }
0x111f   :  { %v1874_v34 = vpop.f32.mrf.mxu0 }
0x1120   :  { %v1878_v36 = vadd.f32 %v1874_v34, %v191_v33 }
0x1121   :  { %v2875_v38 = vpop.f32.mrf.mxu0 }
0x1122   :  { %2996 = vtanh.f32 %v1878_v36 }
0x112a   :  { %v2995_v39 = vpop.eup %2994 }
0x112b   :  { %1793 = vrot.lane.b32.xlu0 %v2995_v39, %s3057_s15  ;;  %v1789_v40 = vadd.f32 1.0, %v2995_v39 }
0x112d   :  { %v1790_v41 = vmul.f32 0.5, %v1789_v40 }
0x112f   :  { %v2997_v37 = vpop.eup %2996  ;;  %v1791_v55 = vmul.f32 %v1790_v41, %v3538_v23  ;;  %v196_v23 = vadd.f32 %v3029_v22, %v3309_v54 }
0x1130   :  { %1884 = vrot.lane.b32.xlu1 %v2997_v37, %s3057_s15  ;;  %v1880_v43 = vadd.f32 1.0, %v2997_v37 }
0x1132   :  { %v1881_v46 = vmul.f32 0.5, %v1880_v43 }
0x1134   :  { %v1882_v49 = vmul.f32 %v1881_v46, %v3540_v24 }
0x119d   :  { %v1794_v42 = vpop.permute.xlu0 %1793 }
0x119e   :  { %v1796_v45 = vmul.f32 %v1794_v42, %v1790_v41 }
0x11a0   :  { %1798 = vrot.lane.b32.xlu0 %v1796_v45, %s3058_s18 }
0x11a2   :  { %v1885_v50 = vpop.permute.xlu1 %1884 }
0x11a3   :  { %v1887_v14 = vmul.f32 %v1885_v50, %v1881_v46 }
0x11a5   :  { %1889 = vrot.lane.b32.xlu1 %v1887_v14, %s3058_s18 }
0x1212   :  { %v1799_v47 = vpop.permute.xlu0 %1798 }
0x1213   :  { %v3589_v48 = vadd.f32 %v1799_v47, %v1791_v55 }
0x1215   :  { %2998 = vtanh.f32 %v3589_v48 }
0x1217   :  { %v1890_v56 = vpop.permute.xlu1 %1889 }
0x1218   :  { %v3593_v58 = vadd.f32 %v1890_v56, %v1882_v49 }
0x121a   :  { %3000 = vtanh.f32 %v3593_v58 }
0x1222   :  { %v2999_v59 = vpop.eup %2998 }
0x1223   :  { %1804 = vrot.lane.b32.xlu0 %v2999_v59, %s3057_s15 }
0x1227   :  { %v3001_v60 = vpop.eup %3000 }
0x1228   :  { %1895 = vrot.lane.b32.xlu1 %v3001_v60, %s3057_s15 }
0x1295   :  { %v1805_v61 = vpop.permute.xlu0 %1804 }
0x1296   :  { %v1807_v62 = vmul.f32 %v1805_v61, %v1790_v41 }
0x1298   :  { %1900 = vrot.lane.b32.xlu0 %v1807_v62, %s3058_s18 }
0x129a   :  { %v1896_v63 = vpop.permute.xlu1 %1895 }
0x129b   :  { %v1898_v1 = vmul.f32 %v1896_v63, %v1881_v46 }
0x129d   :  { %1975 = vrot.lane.b32.xlu1 %v1898_v1, %s3058_s18 }
0x130a   :  { %v1901_v2 = vpop.permute.xlu0 %1900 }
0x130b   :  { %2885 = vmatmul.mubr.msk.f32.vlgmr.msra.gmra.mxu1 %vm220_vm3, %v1901_v2  ;;  %v2354_v2 = vld [vmem:[%s3729_s6 + $0x18] sm:$0xff] }
0x130c   :  { %2899 = vmatpush3.msra.mxu1 %v3018_v5  ;;  %2906 = vmatprep.mubr.msk.f32.mxu1 %vm3056_vm0, %v3055_v0  ;;  %v2352_v5 = vld [vmem:[%s3729_s6 + $0x8] sm:$0xff] }
0x130d   :  { %2900 = vmatprep.subr.mxu1 %v3055_v0 }
0x130e   :  { %2901 = vmatpush3.msra.mxu1 %v3019_v51  ;;  %v2351_v51 = vld [vmem:[%s3729_s6] sm:$0xff] }
0x130f   :  { %2902 = vmatprep.subr.mxu1 %v3055_v0  ;;  %v1976_v6 = vpop.permute.xlu1 %1975 }
0x1310   :  { %2903 = vmatpush3.msra.mxu1 %v3020_v8  ;;  %2896 = vmatmul.mubr.msk.f32.vlgmr.msra.gmra.mxu0 %vm220_vm3, %v1976_v6 }
0x1311   :  { %2904 = vmatprep.subr.mxu1 %v3055_v0  ;;  %2910 = vmatpush3.msra.mxu0 %v3021_v10 }
0x1312   :  { %2905 = vmatpush3.msra.mxu1 %v3022_v11  ;;  %2911 = vmatprep.subr.mxu0 %v3055_v0 }
0x1313   :  { %2907 = vmatmul.mubr.msk.f32.vlgmr.msra.gmra.mxu1 %vm220_vm3, %v1976_v6  ;;  %2920 = vmatprep.subr.mxu1 %v3055_v0 }
0x1314   :  { %2921 = vmatpush3.msra.mxu1 %v3023_v12  ;;  %2912 = vmatpush3.msra.mxu0 %v3024_v13 }
0x1315   :  { %2922 = vmatprep.subr.mxu1 %v3055_v0  ;;  %2913 = vmatprep.subr.mxu0 %v3055_v0 }
0x1316   :  { %2923 = vmatpush3.msra.mxu1 %v3025_v15  ;;  %2914 = vmatpush3.msra.mxu0 %v3026_v16 }
0x1317   :  { %2924 = vmatprep.subr.mxu1 %v3055_v0  ;;  %2915 = vmatprep.subr.mxu0 %v3055_v0 }
0x1318   :  { %2925 = vmatpush3.msra.mxu1 %v3027_v52  ;;  %2928 = vmatprep.mubr.msk.f32.mxu1 %vm3056_vm0, %v3055_v0 }
0x1319   :  { %2926 = vmatprep.subr.mxu1 %v3055_v0  ;;  %2916 = vmatpush3.msra.mxu0 %v3028_v17 }
0x131a   :  { %2927 = vmatpush3.msra.mxu1 %v3260_v44  ;;  %2917 = vmatprep.mubr.msk.f32.mxu0 %vm3056_vm0, %v3055_v0 }
0x131b   :  { %2931 = vmatprep.subr.mxu0 %v3055_v0 }
0x13cb   :  { %v1970_v18 = vpop.f32.mrf.mxu1 }
0x13cd   :  { %v2886_v19 = vpop.f32.mrf.mxu1 }
0x13d0   :  { %v2045_v20 = vpop.f32.mrf.mxu0 }
0x13d1   :  { %v2046_v21 = vadd.f32 %v2045_v20, %v1970_v18 }
0x13d2   :  { %v2897_v24 = vpop.f32.mrf.mxu0 }
0x13d3   :  { %v2049_v25 = vadd.f32 %v3318_v57, %v2046_v21  ;;  %v2136_v26 = vpop.f32.mrf.mxu1 }
0x13d4   :  { %v2140_v44 = vadd.f32 %v2136_v26, %v196_v23 }
0x13d5   :  { %3002 = vtanh.f32 %v2049_v25  ;;  %v2908_v27 = vpop.f32.mrf.mxu1 }
0x13d6   :  { %3004 = vtanh.f32 %v2140_v44 }
0x13e2   :  { %v3003_v30 = vpop.eup %3002 }
0x13e3   :  { %v3005_v28 = vpop.eup %3004  ;;  %2055 = vrot.lane.b32.xlu0 %v3003_v30, %s3057_s15  ;;  %v2051_v32 = vadd.f32 1.0, %v3003_v30 }
0x13e4   :  { %2146 = vrot.lane.b32.xlu1 %v3005_v28, %s3057_s15  ;;  %v2142_v53 = vadd.f32 1.0, %v3005_v28 }
0x13e5   :  { %v2052_v35 = vmul.f32 0.5, %v2051_v32 }
0x13e6   :  { %v2143_v3 = vmul.f32 0.5, %v2142_v53 }
0x13e7   :  { %v2053_v29 = vmul.f32 %v2052_v35, %v3589_v48 }
0x13e8   :  { %v2144_v31 = vmul.f32 %v2143_v3, %v3593_v58 }
0x1455   :  { %v2056_v4 = vpop.permute.xlu0 %2055 }
0x1456   :  { %v2147_v54 = vpop.permute.xlu1 %2146  ;;  %v2058_v7 = vmul.f32 %v2056_v4, %v2052_v35 }
0x1457   :  { %v2149_v9 = vmul.f32 %v2147_v54, %v2143_v3 }
0x1458   :  { %2060 = vrot.lane.b32.xlu0 %v2058_v7, %s3058_s18 }
0x1459   :  { %2151 = vrot.lane.b32.xlu1 %v2149_v9, %s3058_s18 }
0x14ca   :  { %v2061_v33 = vpop.permute.xlu0 %2060 }
0x14cb   :  { %v2152_v34 = vpop.permute.xlu1 %2151  ;;  %v2063_v36 = vadd.f32 %v2061_v33, %v2053_v29 }
0x14cc   :  { %v3665_v38 = vadd.f32 %v2152_v34, %v2144_v31 }
0x14cd   :  { %3006 = vtanh.f32 %v2063_v36 }
0x14ce   :  { %3008 = vtanh.f32 %v3665_v38 }
0x14da   :  { %v3007_v39 = vpop.eup %3006 }
0x14db   :  { %v3009_v37 = vpop.eup %3008  ;;  %2066 = vrot.lane.b32.xlu0 %v3007_v39, %s3057_s15 }
0x14dc   :  { %2157 = vrot.lane.b32.xlu1 %v3009_v37, %s3057_s15 }
0x154d   :  { %v2067_v40 = vpop.permute.xlu0 %2066 }
0x154e   :  { %v2158_v41 = vpop.permute.xlu1 %2157  ;;  %v2069_v42 = vmul.f32 %v2067_v40, %v2052_v35 }
0x154f   :  { %v2160_v43 = vmul.f32 %v2158_v41, %v2143_v3 }
0x1550   :  { %2162 = vrot.lane.b32.xlu0 %v2069_v42, %s3058_s18 }
0x1551   :  { %2237 = vrot.lane.b32.xlu1 %v2160_v43, %s3058_s18 }
0x15c2   :  { %v2163_v45 = vpop.permute.xlu0 %2162 }
0x15c3   :  { %v2238_v46 = vpop.permute.xlu1 %2237  ;;  %2918 = vmatmul.mubr.msk.f32.vlgmr.msra.gmra.mxu0 %vm220_vm3, %v2163_v45 }
0x15c4   :  { %2333 = vst.msk [vmem:[%s3732_s9] sm:$0xff] %vm220_vm3, %v2238_v46  ;;  %2929 = vmatmul.mubr.msk.f32.vlgmr.msra.gmra.mxu1 %vm220_vm3, %v2238_v46  ;;  %2939 = vmatprep.mubr.msk.f32.mxu0 %vm3056_vm0, %v3055_v0 }
0x15c5   :  { %2932 = vmatpush3.msra.mxu0 %v2354_v2 }
0x15c6   :  { %2933 = vmatprep.subr.mxu0 %v3055_v0 }
0x1683   :  { %v2232_v50 = vpop.f32.mrf.mxu0 }
0x1684   :  { %v2307_v14 = vpop.f32.mrf.mxu1 }
0x1685   :  { %v2308_v55 = vadd.f32 %v2307_v14, %v2232_v50  ;;  %v2919_v47 = vpop.f32.mrf.mxu0 }
0x1686   :  { %v2930_v48 = vpop.f32.mrf.mxu1 }
0x1687   :  { %v2311_v49 = vadd.f32 %v3318_v57, %v2308_v55  ;;  %v2353_v57 = vld [vmem:[%s3729_s6 + $0x10] sm:$0xff] }
0x1688   :  { %2934 = vmatpush3.msra.mxu0 %v2353_v57 }
0x1689   :  { %3010 = vtanh.f32 %v2311_v49  ;;  %2935 = vmatprep.subr.mxu0 %v3055_v0 }
0x168a   :  { %2936 = vmatpush3.msra.mxu0 %v2352_v5 }
0x168b   :  { %2937 = vmatprep.subr.mxu0 %v3055_v0  ;;  %v2508_v0 = vld [vmem:[%s3730_s7] ss:$0 sm:$0xff] }
0x168c   :  { %2938 = vmatpush3.msra.mxu0 %v2351_v51 }
0x1696   :  { %v3011_v56 = vpop.eup %3010 }
0x1697   :  { %2317 = vrot.lane.b32.xlu0 %v3011_v56, %s3057_s15  ;;  %v2313_v58 = vadd.f32 1.0, %v3011_v56 }
0x1699   :  { %v2314_v59 = vmul.f32 0.5, %v2313_v58 }
0x169b   :  { %v2315_v62 = vmul.f32 %v2314_v59, %v2063_v36 }
0x1709   :  { %v2318_v60 = vpop.permute.xlu0 %2317 }
0x170a   :  { %v2320_v61 = vmul.f32 %v2318_v60, %v2314_v59 }
0x170c   :  { %2322 = vrot.lane.b32.xlu1 %v2320_v61, %s3058_s18 }
0x177e   :  { %v2323_v63 = vpop.permute.xlu1 %2322 }
0x177f   :  { %v2325_v1 = vadd.f32 %v2323_v63, %v2315_v62 }
0x1781   :  { %3012 = vtanh.f32 %v2325_v1 }
0x178e   :  { %v3013_v6 = vpop.eup %3012 }
0x178f   :  { %2328 = vrot.lane.b32.xlu0 %v3013_v6, %s3057_s15  ;;  %s3059_s15 = smov 96  }
0x1801   :  { %v2329_v8 = vpop.permute.xlu0 %2328 }
0x1802   :  { %v2331_v10 = vmul.f32 %v2329_v8, %v2314_v59 }
0x1804   :  { %2340 = vrot.lane.b32.xlu1 %v2331_v10, %s3058_s18 }
0x1876   :  { %v2341_v11 = vpop.permute.xlu1 %2340 }
0x1877   :  { %2506 = vst.msk [vmem:[%s3732_s9 + $0x8] sm:$0xff] %vm220_vm3, %v2341_v11  ;;  %2940 = vmatmul.mubr.msk.f32.vlgmr.msra.gmra.mxu0 %vm220_vm3, %v2341_v11 }
0x1937   :  { %v2430_v12 = vpop.f32.mrf.mxu0 }
0x1938   :  { %v2431_v13 = vadd.f32 %v2508_v0, %v2430_v12 }
0x1939   :  { %v2941_v15 = vpop.f32.mrf.mxu0 }
0x193a   :  { %v2435_v16 = vsel %vm2434_vm4, %v2431_v13, -inf }
0x193b   :  { %2436 = vmax.xlane.f32.xlu0 %v2435_v16 }
0x1951   :  { %2335 = vrot.lane.b32.xlu0 %v3665_v38, %s3059_s15 }
0x19c4   :  { %v2437_v52 = vpop.xlane.xlu0 %2436 }
0x19c5   :  { %v2438_v17 = vsub.f32 %v2431_v13, %v2437_v52 }
0x19c7   :  { %v2439_v18 = vmul.f32 1.442695, %v2438_v17 }
0x19c8   :  { %v2336_v19 = vpop.permute.xlu0 %2335 }
0x19c9   :  { %3014 = vpow2.f32 %v2439_v18  ;;  %2338 = vst.msk [vmem:[%s3733_s10] sm:$0xff] %vm220_vm3, %v2336_v19 }
0x19d6   :  { %v3015_v20 = vpop.eup %3014 }
0x19d7   :  { %v2441_v21 = vsel %vm2434_vm4, %v3015_v20, 0.0 }
0x19d8   :  { %2442 = vadd.xlane.f32.xlu1 %v2441_v21 }
0x19e9   :  { %2346 = vrot.lane.b32.xlu1 %v2325_v1, %s3059_s15 }
0x1a61   :  { %v2443_v22 = vpop.xlane.xlu1 %2442 }
0x1a62   :  { %3016 = vrcp.f32 %v2443_v22 }
0x1a65   :  { %v2347_v23 = vpop.permute.xlu1 %2346 }
0x1a66   :  { %2507 = vst.msk [vmem:[%s3733_s10 + $0x8] sm:$0xff] %vm220_vm3, %v2347_v23 }
0x1a6f   :  { %v3017_v24 = vpop.eup %3016 }
0x1a70   :  { %v2445_v25 = vmul.f32 %v3017_v24, %v3015_v20 }
0x1a72   :  { %2446 = vst.msk [vmem:[%s3731_s8] sm:$0xff] %vm2434_vm4, %v2445_v25 }
0x1a73   :  { %2459 = vsyncpa [#allocation3], 1 }

</bundles_post_ra>
